<compile_context>
chip_gen: v7x
topology: tpu7x:2x2x1
jax: 0.10.0
libtpu: 0.0.40
codegen_flags: <defaults>
</compile_context>

<pallas_src>
import jax
import jax.numpy as jnp
from jax.experimental import pallas as pl
from jax.experimental.pallas import tpu as pltpu

# ---------------- model dims (from the module) ----------------
INPUT_SIZE = 50          # vocab size (small, synthetic)
EMBED_SIZE = 250         # hardcoded in Decoder.__init__
HIDDEN_SIZE = 100        # module-level hidden_size
NUM_LAYERS = 2           # module-level num_layers
OUTPUT_SIZE = 3          # len(CLASSES)
BATCH = 4
DP = 0.5                 # dropout prob (identity at inference)

# ---------------- padded kernel dims ----------------
B_PAD = 8                # batch -> full sublane group
H_PAD = 128              # per-gate hidden -> full lane tile
E_PAD = 256              # embedding -> 2 lane tiles (preprocess only)
V_PAD = 128              # vocab -> 1 lane tile (one-hot gather matmul)
O_PAD = 128              # fc output -> full lane tile


def decoder_kernel(ids_ref, hin_ref, cin_ref,
                   w0e_ref, whh0_ref, b0_ref,
                   wih1_ref, whh1_ref, b1_ref,
                   wfc_ref, bfc_ref,
                   pred_ref, hout_ref, cout_ref):
    HP = H_PAD
    t = pl.program_id(0)

    # step 0: seed the carried state (output refs are VMEM-resident across the
    # whole grid because their index_map is constant).
    @pl.when(t == 0)
    def _():
        hout_ref[...] = hin_ref[...]
        cout_ref[...] = cin_ref[...]

    # ---- token one-hot (embedding + layer-0 input weight are pre-folded) ----
    ids = ids_ref[0]                                               # (8, 1) int32
    onehot = (jax.lax.broadcasted_iota(jnp.int32, (B_PAD, V_PAD), 1)
              == ids).astype(jnp.bfloat16)                         # (8, 128)

    h0 = hout_ref[0]                                               # (8, 128) f32
    c0 = cout_ref[0]
    h1 = hout_ref[1]
    c1 = cout_ref[1]

    # ---- LSTM layer 0: onehot @ (table@W_ih0) + h0 @ W_hh0 + b0 ----
    g0 = (jnp.dot(onehot, w0e_ref[...], preferred_element_type=jnp.float32)
          + jnp.dot(h0.astype(jnp.bfloat16), whh0_ref[...],
                    preferred_element_type=jnp.float32)
          + b0_ref[...])                                           # (8, 512)
    i0 = jax.nn.sigmoid(g0[:, 0 * HP:1 * HP])
    f0 = jax.nn.sigmoid(g0[:, 1 * HP:2 * HP])
    gg0 = jnp.tanh(g0[:, 2 * HP:3 * HP])
    o0 = jax.nn.sigmoid(g0[:, 3 * HP:4 * HP])
    c0n = f0 * c0 + i0 * gg0          # pad lanes: 0.5*0 + 0.5*0 = 0
    h0n = o0 * jnp.tanh(c0n)          # pad lanes: 0.5*tanh(0)   = 0

    # ---- LSTM layer 1 (inter-layer dropout = identity at inference) ----
    g1 = (jnp.dot(h0n.astype(jnp.bfloat16), wih1_ref[...],
                  preferred_element_type=jnp.float32)
          + jnp.dot(h1.astype(jnp.bfloat16), whh1_ref[...],
                    preferred_element_type=jnp.float32)
          + b1_ref[...])                                           # (8, 512)
    i1 = jax.nn.sigmoid(g1[:, 0 * HP:1 * HP])
    f1 = jax.nn.sigmoid(g1[:, 1 * HP:2 * HP])
    gg1 = jnp.tanh(g1[:, 2 * HP:3 * HP])
    o1 = jax.nn.sigmoid(g1[:, 3 * HP:4 * HP])
    c1n = f1 * c1 + i1 * gg1
    h1n = o1 * jnp.tanh(c1n)

    # ---- final linear head (lane-dense padded output) ----
    pred_ref[0] = (jnp.dot(h1n.astype(jnp.bfloat16), wfc_ref[...],
                           preferred_element_type=jnp.float32)
                   + bfc_ref[...])

    # ---- carry updated states (also final outputs) ----
    hout_ref[0] = h0n
    hout_ref[1] = h1n
    cout_ref[0] = c0n
    cout_ref[1] = c1n


def preprocess_params(params):
    """One-time glue: transpose, fold biases & embedding, pad, cast to bf16."""
    H, E, O, V = HIDDEN_SIZE, EMBED_SIZE, OUTPUT_SIZE, INPUT_SIZE
    HP, EP, VP = H_PAD, E_PAD, V_PAD

    def pad_gate_cols(w_t, n_in_pad):
        # w_t: (n_in, 4H) -> (n_in_pad, 4*HP); gate k lives at cols [k*HP, k*HP+H)
        n_in = w_t.shape[0]
        out = jnp.zeros((n_in_pad, 4 * HP), jnp.float32)
        for k in range(4):
            out = out.at[:n_in, k * HP:k * HP + H].set(w_t[:, k * H:(k + 1) * H])
        return out

    def pad_gate_bias(b):
        out = jnp.zeros((1, 4 * HP), jnp.float32)
        for k in range(4):
            out = out.at[0, k * HP:k * HP + H].set(b[k * H:(k + 1) * H])
        return out

    # embedding folded into layer-0 input weight: (128, 256) @ (256, 512)
    table = jnp.zeros((VP, EP), jnp.float32).at[:V, :E].set(
        params["embedding"].astype(jnp.float32))
    wih0 = pad_gate_cols(params["w_ih_l0"].T.astype(jnp.float32), EP)
    w0e = jnp.dot(table, wih0)                                        # (128, 512)
    whh0 = pad_gate_cols(params["w_hh_l0"].T.astype(jnp.float32), HP)  # (128, 512)
    b0 = pad_gate_bias((params["b_ih_l0"] + params["b_hh_l0"]).astype(jnp.float32))

    wih1 = pad_gate_cols(params["w_ih_l1"].T.astype(jnp.float32), HP)  # (128, 512)
    whh1 = pad_gate_cols(params["w_hh_l1"].T.astype(jnp.float32), HP)  # (128, 512)
    b1 = pad_gate_bias((params["b_ih_l1"] + params["b_hh_l1"]).astype(jnp.float32))

    wfc = jnp.zeros((HP, O_PAD), jnp.float32).at[:H, :O].set(
        params["w_fc"].T.astype(jnp.float32))
    bfc = jnp.zeros((1, O_PAD), jnp.float32).at[0, :O].set(
        params["b_fc"].astype(jnp.float32))

    return {"w0e": w0e.astype(jnp.bfloat16),
            "whh0": whh0.astype(jnp.bfloat16),
            "b0": b0,
            "wih1": wih1.astype(jnp.bfloat16),
            "whh1": whh1.astype(jnp.bfloat16),
            "b1": b1,
            "wfc": wfc.astype(jnp.bfloat16),
            "bfc": bfc}


def decoder_decode(ids_seq, hidden, cell, prep):
    """Run T decode steps inside ONE pallas_call (grid=(T,)).

    ids_seq: (T, B) int tokens; hidden/cell: (L, B, H).
    Returns (predictions (T, B, 3), hidden (L, B, H), cell (L, B, H)).
    """
    T, B = ids_seq.shape
    L, _, H = hidden.shape

    ids_p = jnp.zeros((T, B_PAD, 1), jnp.int32).at[:, :B, 0].set(
        ids_seq.astype(jnp.int32))
    h_in = jnp.zeros((L, B_PAD, H_PAD), jnp.float32).at[:, :B, :H].set(
        hidden.astype(jnp.float32))
    c_in = jnp.zeros((L, B_PAD, H_PAD), jnp.float32).at[:, :B, :H].set(
        cell.astype(jnp.float32))

    G4 = 4 * H_PAD
    in_specs = [
        pl.BlockSpec((1, B_PAD, 1), lambda t: (t, 0, 0)),        # ids (per step)
        pl.BlockSpec((L, B_PAD, H_PAD), lambda t: (0, 0, 0)),    # h_in
        pl.BlockSpec((L, B_PAD, H_PAD), lambda t: (0, 0, 0)),    # c_in
        pl.BlockSpec((V_PAD, G4), lambda t: (0, 0)),             # w0e (resident)
        pl.BlockSpec((H_PAD, G4), lambda t: (0, 0)),             # whh0
        pl.BlockSpec((1, G4), lambda t: (0, 0)),                 # b0
        pl.BlockSpec((H_PAD, G4), lambda t: (0, 0)),             # wih1
        pl.BlockSpec((H_PAD, G4), lambda t: (0, 0)),             # whh1
        pl.BlockSpec((1, G4), lambda t: (0, 0)),                 # b1
        pl.BlockSpec((H_PAD, O_PAD), lambda t: (0, 0)),          # wfc
        pl.BlockSpec((1, O_PAD), lambda t: (0, 0)),              # bfc
    ]
    out_specs = (
        pl.BlockSpec((1, B_PAD, O_PAD), lambda t: (t, 0, 0)),    # per-step preds
        pl.BlockSpec((L, B_PAD, H_PAD), lambda t: (0, 0, 0)),    # carried hidden
        pl.BlockSpec((L, B_PAD, H_PAD), lambda t: (0, 0, 0)),    # carried cell
    )
    out_shapes = (
        jax.ShapeDtypeStruct((T, B_PAD, O_PAD), jnp.float32),
        jax.ShapeDtypeStruct((L, B_PAD, H_PAD), jnp.float32),
        jax.ShapeDtypeStruct((L, B_PAD, H_PAD), jnp.float32),
    )

    pred_p, h_p, c_p = pl.pallas_call(
        decoder_kernel,
        grid=(T,),
        out_shape=out_shapes,
        in_specs=in_specs,
        out_specs=out_specs,
        compiler_params=pltpu.CompilerParams(
            dimension_semantics=("arbitrary",)),   # recurrent axis: sequential
    )(ids_p, h_in, c_in,
      prep["w0e"], prep["whh0"], prep["b0"],
      prep["wih1"], prep["whh1"], prep["b1"],
      prep["wfc"], prep["bfc"])

    return (pred_p[:, :B, :OUTPUT_SIZE],
            h_p[:, :B, :H],
            c_p[:, :B, :H])


def decoder_forward(x_tokens, hidden, cell, prep):
    """Single-step forward matching the PyTorch module semantics."""
    preds, h_new, c_new = decoder_decode(x_tokens[None, :], hidden, cell, prep)
    return preds[0], h_new, c_new


# ---------------- pure-JAX reference (unpadded f32 math) ----------------
def _lstm_cell_ref(x, h, c, w_ih_t, w_hh_t, b, H):
    gates = jnp.dot(x, w_ih_t) + jnp.dot(h, w_hh_t) + b
    i = jax.nn.sigmoid(gates[:, 0 * H:1 * H])
    f = jax.nn.sigmoid(gates[:, 1 * H:2 * H])
    g = jnp.tanh(gates[:, 2 * H:3 * H])
    o = jax.nn.sigmoid(gates[:, 3 * H:4 * H])
    c_new = f * c + i * g
    h_new = o * jnp.tanh(c_new)
    return h_new, c_new


def decoder_reference(x_tokens, hidden, cell, params):
    emb = params["embedding"][x_tokens].astype(jnp.float32)
    H = hidden.shape[-1]
    h0, c0 = hidden[0], cell[0]
    h1, c1 = hidden[1], cell[1]
    h0n, c0n = _lstm_cell_ref(emb, h0, c0, params["w_ih_l0"].T, params["w_hh_l0"].T,
                              (params["b_ih_l0"] + params["b_hh_l0"])[None, :], H)
    h1n, c1n = _lstm_cell_ref(h0n, h1, c1, params["w_ih_l1"].T, params["w_hh_l1"].T,
                              (params["b_ih_l1"] + params["b_hh_l1"])[None, :], H)
    pred = jnp.dot(h1n, params["w_fc"].T) + params["b_fc"][None, :]
    return pred, jnp.stack([h0n, h1n], 0), jnp.stack([c0n, c1n], 0)


def init_params(key):
    ks = jax.random.split(key, 12)
    s = 0.1
    H, E, O, V = HIDDEN_SIZE, EMBED_SIZE, OUTPUT_SIZE, INPUT_SIZE
    return {
        "embedding": s * jax.random.normal(ks[0], (V, E), jnp.float32),
        "w_ih_l0": s * jax.random.normal(ks[1], (4 * H, E), jnp.float32),
        "w_hh_l0": s * jax.random.normal(ks[2], (4 * H, H), jnp.float32),
        "b_ih_l0": s * jax.random.normal(ks[3], (4 * H,), jnp.float32),
        "b_hh_l0": s * jax.random.normal(ks[4], (4 * H,), jnp.float32),
        "w_ih_l1": s * jax.random.normal(ks[5], (4 * H, H), jnp.float32),
        "w_hh_l1": s * jax.random.normal(ks[6], (4 * H, H), jnp.float32),
        "b_ih_l1": s * jax.random.normal(ks[7], (4 * H,), jnp.float32),
        "b_hh_l1": s * jax.random.normal(ks[8], (4 * H,), jnp.float32),
        "w_fc": s * jax.random.normal(ks[9], (O, H), jnp.float32),
        "b_fc": s * jax.random.normal(ks[10], (O,), jnp.float32),
    }


if __name__ == "__main__":
    key = jax.random.PRNGKey(0)
    kp, kx, kh, kc = jax.random.split(key, 4)

    params = init_params(kp)
    prep = preprocess_params(params)     # one-time weight glue (hoisted)
    jax.block_until_ready(jax.tree_util.tree_leaves(prep))

    T = 6
    ids_seq = jax.random.randint(kx, (T, BATCH), 0, INPUT_SIZE)            # (T, B)
    hidden = 0.1 * jax.random.normal(kh, (NUM_LAYERS, BATCH, HIDDEN_SIZE))
    cell = 0.1 * jax.random.normal(kc, (NUM_LAYERS, BATCH, HIDDEN_SIZE))

    # ---- single-step forward (exact module semantics) ----
    pred, h_new, c_new = decoder_forward(ids_seq[0], hidden, cell, prep)
    jax.block_until_ready((pred, h_new, c_new))
    pred_r, h_r, c_r = decoder_reference(ids_seq[0], hidden, cell, params)
    assert pred.shape == (BATCH, OUTPUT_SIZE)
    assert h_new.shape == (NUM_LAYERS, BATCH, HIDDEN_SIZE)
    assert c_new.shape == (NUM_LAYERS, BATCH, HIDDEN_SIZE)
    # bf16 weights -> loosened tolerance (review note)
    assert jnp.allclose(pred, pred_r, atol=2e-2)
    assert jnp.allclose(h_new, h_r, atol=2e-2)
    assert jnp.allclose(c_new, c_r, atol=2e-2)

    # ---- T-step decode inside a single pallas_call (grid=(T,)) ----
    preds, hT, cT = decoder_decode(ids_seq, hidden, cell, prep)
    jax.block_until_ready((preds, hT, cT))

    h_ref, c_ref = hidden, cell
    ref_preds = []
    for t in range(T):
        p_t, h_ref, c_ref = decoder_reference(ids_seq[t], h_ref, c_ref, params)
        ref_preds.append(p_t)
    ref_preds = jnp.stack(ref_preds, 0)
    assert preds.shape == (T, BATCH, OUTPUT_SIZE)
    assert jnp.allclose(preds, ref_preds, atol=5e-2)
    assert jnp.allclose(hT, h_ref, atol=5e-2)
    assert jnp.allclose(cT, c_ref, atol=5e-2)

    print("KERNEL_OK")
</pallas_src>

<mosaic_0001>
module attributes {stable_mosaic.version = 11 : i64} {
  func.func @decoder_kernel(%arg0: i32, %arg1: memref<1x8x1xi32, #tpu.memory_space<vmem>>, %arg2: memref<2x8x128xf32, #tpu.memory_space<vmem>>, %arg3: memref<2x8x128xf32, #tpu.memory_space<vmem>>, %arg4: memref<128x512xbf16, #tpu.memory_space<vmem>>, %arg5: memref<128x512xbf16, #tpu.memory_space<vmem>>, %arg6: memref<1x512xf32, #tpu.memory_space<vmem>>, %arg7: memref<128x512xbf16, #tpu.memory_space<vmem>>, %arg8: memref<128x512xbf16, #tpu.memory_space<vmem>>, %arg9: memref<1x512xf32, #tpu.memory_space<vmem>>, %arg10: memref<128x128xbf16, #tpu.memory_space<vmem>>, %arg11: memref<1x128xf32, #tpu.memory_space<vmem>>, %arg12: memref<1x8x128xf32, #tpu.memory_space<vmem>>, %arg13: memref<2x8x128xf32, #tpu.memory_space<vmem>>, %arg14: memref<2x8x128xf32, #tpu.memory_space<vmem>>) attributes {dimension_semantics = [#tpu.dimension_semantics<arbitrary>], iteration_bounds = array<i64: 1>, scalar_prefetch = 0 : i64, scratch_operands = 0 : i64, tpu.core_type = #tpu.core_type<tc>, window_params = [{transform_indices = @transform_0, window_bounds = array<i64: 1, 8, 1>}, {pipeline_mode = #tpu.pipeline_mode<synchronous>, transform_indices = @transform_1, window_bounds = array<i64: 2, 8, 128>}, {pipeline_mode = #tpu.pipeline_mode<synchronous>, transform_indices = @transform_2, window_bounds = array<i64: 2, 8, 128>}, {pipeline_mode = #tpu.pipeline_mode<synchronous>, transform_indices = @transform_3, window_bounds = array<i64: 128, 512>}, {pipeline_mode = #tpu.pipeline_mode<synchronous>, transform_indices = @transform_4, window_bounds = array<i64: 128, 512>}, {pipeline_mode = #tpu.pipeline_mode<synchronous>, transform_indices = @transform_5, window_bounds = array<i64: 1, 512>}, {pipeline_mode = #tpu.pipeline_mode<synchronous>, transform_indices = @transform_6, window_bounds = array<i64: 128, 512>}, {pipeline_mode = #tpu.pipeline_mode<synchronous>, transform_indices = @transform_7, window_bounds = array<i64: 128, 512>}, {pipeline_mode = #tpu.pipeline_mode<synchronous>, transform_indices = @transform_8, window_bounds = array<i64: 1, 512>}, {pipeline_mode = #tpu.pipeline_mode<synchronous>, transform_indices = @transform_9, window_bounds = array<i64: 128, 128>}, {pipeline_mode = #tpu.pipeline_mode<synchronous>, transform_indices = @transform_10, window_bounds = array<i64: 1, 128>}, {transform_indices = @transform_11, window_bounds = array<i64: 1, 8, 128>}, {pipeline_mode = #tpu.pipeline_mode<synchronous>, transform_indices = @transform_12, window_bounds = array<i64: 2, 8, 128>}, {pipeline_mode = #tpu.pipeline_mode<synchronous>, transform_indices = @transform_13, window_bounds = array<i64: 2, 8, 128>}]} {
    %c0_i32 = arith.constant 0 : i32
    %0 = arith.cmpi eq, %arg0, %c0_i32 : i32
    %1 = arith.extui %0 : i1 to i32
    %c0_i32_0 = arith.constant 0 : i32
    %2 = arith.cmpi ne, %1, %c0_i32_0 : i32
    scf.if %2 {
      %c0_55 = arith.constant 0 : index
      %c0_56 = arith.constant 0 : index
      %c0_57 = arith.constant 0 : index
      %109 = vector.load %arg2[%c0_55, %c0_56, %c0_57] : memref<2x8x128xf32, #tpu.memory_space<vmem>>, vector<2x8x128xf32>
      %c0_58 = arith.constant 0 : index
      %c0_59 = arith.constant 0 : index
      %c0_60 = arith.constant 0 : index
      %110 = vector.load %arg13[%c0_58, %c0_59, %c0_60] : memref<2x8x128xf32, #tpu.memory_space<vmem>>, vector<2x8x128xf32>
      tpu.vector_store %arg13[%c0_58, %c0_59, %c0_60], %109 {strides = array<i32>} : memref<2x8x128xf32, #tpu.memory_space<vmem>>, vector<2x8x128xf32>,
      %c0_61 = arith.constant 0 : index
      %c0_62 = arith.constant 0 : index
      %c0_63 = arith.constant 0 : index
      %111 = vector.load %arg3[%c0_61, %c0_62, %c0_63] : memref<2x8x128xf32, #tpu.memory_space<vmem>>, vector<2x8x128xf32>
      %c0_64 = arith.constant 0 : index
      %c0_65 = arith.constant 0 : index
      %c0_66 = arith.constant 0 : index
      %112 = vector.load %arg14[%c0_64, %c0_65, %c0_66] : memref<2x8x128xf32, #tpu.memory_space<vmem>>, vector<2x8x128xf32>
      tpu.vector_store %arg14[%c0_64, %c0_65, %c0_66], %111 {strides = array<i32>} : memref<2x8x128xf32, #tpu.memory_space<vmem>>, vector<2x8x128xf32>,
    } else {
    }
    %c0 = arith.constant 0 : index
    %c0_1 = arith.constant 0 : index
    %c0_2 = arith.constant 0 : index
    %3 = vector.load %arg1[%c0, %c0_1, %c0_2] : memref<1x8x1xi32, #tpu.memory_space<vmem>>, vector<1x8x1xi32>
    %4 = vector.shape_cast %3 : vector<1x8x1xi32> to vector<8x1xi32>
    %5 = tpu.iota {dimensions = array<i32: 1>} : vector<8x128xi32>
    %6 = vector.broadcast %4 : vector<8x1xi32> to vector<8x128xi32>
    %7 = arith.cmpi eq, %5, %6 : vector<8x128xi32>
    %8 = arith.extui %7 : vector<8x128xi1> to vector<8x128xi32>
    %9 = arith.sitofp %8 : vector<8x128xi32> to vector<8x128xf32>
    %10 = arith.truncf %9 : vector<8x128xf32> to vector<8x128xbf16>
    %c0_3 = arith.constant 0 : index
    %c0_4 = arith.constant 0 : index
    %c0_5 = arith.constant 0 : index
    %11 = vector.load %arg13[%c0_3, %c0_4, %c0_5] : memref<2x8x128xf32, #tpu.memory_space<vmem>>, vector<1x8x128xf32>
    %12 = vector.shape_cast %11 : vector<1x8x128xf32> to vector<8x128xf32>
    %c0_6 = arith.constant 0 : index
    %c0_7 = arith.constant 0 : index
    %c0_8 = arith.constant 0 : index
    %13 = vector.load %arg14[%c0_6, %c0_7, %c0_8] : memref<2x8x128xf32, #tpu.memory_space<vmem>>, vector<1x8x128xf32>
    %14 = vector.shape_cast %13 : vector<1x8x128xf32> to vector<8x128xf32>
    %c1 = arith.constant 1 : index
    %c0_9 = arith.constant 0 : index
    %c0_10 = arith.constant 0 : index
    %15 = vector.load %arg13[%c1, %c0_9, %c0_10] : memref<2x8x128xf32, #tpu.memory_space<vmem>>, vector<1x8x128xf32>
    %16 = vector.shape_cast %15 : vector<1x8x128xf32> to vector<8x128xf32>
    %c1_11 = arith.constant 1 : index
    %c0_12 = arith.constant 0 : index
    %c0_13 = arith.constant 0 : index
    %17 = vector.load %arg14[%c1_11, %c0_12, %c0_13] : memref<2x8x128xf32, #tpu.memory_space<vmem>>, vector<1x8x128xf32>
    %18 = vector.shape_cast %17 : vector<1x8x128xf32> to vector<8x128xf32>
    %c0_14 = arith.constant 0 : index
    %c0_15 = arith.constant 0 : index
    %19 = vector.load %arg4[%c0_14, %c0_15] : memref<128x512xbf16, #tpu.memory_space<vmem>>, vector<128x512xbf16>
    %cst = arith.constant dense<0.000000e+00> : vector<8x512xf32>
    %20 = tpu.matmul %10, %19, %cst {dimension_numbers = #tpu.dot_dimension_numbers<[1], [0], [0], [1], [0, 0, 1, 1], [], []>} : vector<8x128xbf16>, vector<128x512xbf16>, vector<8x512xf32> -> vector<8x512xf32>
    %21 = arith.truncf %12 : vector<8x128xf32> to vector<8x128xbf16>
    %c0_16 = arith.constant 0 : index
    %c0_17 = arith.constant 0 : index
    %22 = vector.load %arg5[%c0_16, %c0_17] : memref<128x512xbf16, #tpu.memory_space<vmem>>, vector<128x512xbf16>
    %cst_18 = arith.constant dense<0.000000e+00> : vector<8x512xf32>
    %23 = tpu.matmul %21, %22, %cst_18 {dimension_numbers = #tpu.dot_dimension_numbers<[1], [0], [0], [1], [0, 0, 1, 1], [], []>} : vector<8x128xbf16>, vector<128x512xbf16>, vector<8x512xf32> -> vector<8x512xf32>
    %24 = arith.addf %20, %23 : vector<8x512xf32>
    %c0_19 = arith.constant 0 : index
    %c0_20 = arith.constant 0 : index
    %25 = vector.load %arg6[%c0_19, %c0_20] : memref<1x512xf32, #tpu.memory_space<vmem>>, vector<1x512xf32>
    %26 = vector.broadcast %25 : vector<1x512xf32> to vector<8x512xf32>
    %27 = arith.addf %24, %26 : vector<8x512xf32>
    %28 = vector.extract_strided_slice %27 {offsets = [0, 0], sizes = [8, 128], strides = [1, 1]} : vector<8x512xf32> to vector<8x128xf32>
    %29 = arith.negf %28 : vector<8x128xf32>
    %30 = math.exp %29 : vector<8x128xf32>
    %cst_21 = arith.constant 1.000000e+00 : f32
    %31 = vector.broadcast %cst_21 : f32 to vector<8x128xf32>
    %32 = arith.addf %31, %30 : vector<8x128xf32>
    %33 = arith.divf %31, %32 : vector<8x128xf32>
    %34 = vector.extract_strided_slice %27 {offsets = [0, 128], sizes = [8, 128], strides = [1, 1]} : vector<8x512xf32> to vector<8x128xf32>
    %35 = arith.negf %34 : vector<8x128xf32>
    %36 = math.exp %35 : vector<8x128xf32>
    %cst_22 = arith.constant 1.000000e+00 : f32
    %37 = vector.broadcast %cst_22 : f32 to vector<8x128xf32>
    %38 = arith.addf %37, %36 : vector<8x128xf32>
    %39 = arith.divf %37, %38 : vector<8x128xf32>
    %40 = vector.extract_strided_slice %27 {offsets = [0, 256], sizes = [8, 128], strides = [1, 1]} : vector<8x512xf32> to vector<8x128xf32>
    %41 = math.tanh %40 : vector<8x128xf32>
    %42 = vector.extract_strided_slice %27 {offsets = [0, 384], sizes = [8, 128], strides = [1, 1]} : vector<8x512xf32> to vector<8x128xf32>
    %43 = arith.negf %42 : vector<8x128xf32>
    %44 = math.exp %43 : vector<8x128xf32>
    %cst_23 = arith.constant 1.000000e+00 : f32
    %45 = vector.broadcast %cst_23 : f32 to vector<8x128xf32>
    %46 = arith.addf %45, %44 : vector<8x128xf32>
    %47 = arith.divf %45, %46 : vector<8x128xf32>
    %48 = arith.mulf %39, %14 : vector<8x128xf32>
    %49 = arith.mulf %33, %41 : vector<8x128xf32>
    %50 = arith.addf %48, %49 : vector<8x128xf32>
    %51 = math.tanh %50 : vector<8x128xf32>
    %52 = arith.mulf %47, %51 : vector<8x128xf32>
    %53 = arith.truncf %52 : vector<8x128xf32> to vector<8x128xbf16>
    %c0_24 = arith.constant 0 : index
    %c0_25 = arith.constant 0 : index
    %54 = vector.load %arg7[%c0_24, %c0_25] : memref<128x512xbf16, #tpu.memory_space<vmem>>, vector<128x512xbf16>
    %cst_26 = arith.constant dense<0.000000e+00> : vector<8x512xf32>
    %55 = tpu.matmul %53, %54, %cst_26 {dimension_numbers = #tpu.dot_dimension_numbers<[1], [0], [0], [1], [0, 0, 1, 1], [], []>} : vector<8x128xbf16>, vector<128x512xbf16>, vector<8x512xf32> -> vector<8x512xf32>
    %56 = arith.truncf %16 : vector<8x128xf32> to vector<8x128xbf16>
    %c0_27 = arith.constant 0 : index
    %c0_28 = arith.constant 0 : index
    %57 = vector.load %arg8[%c0_27, %c0_28] : memref<128x512xbf16, #tpu.memory_space<vmem>>, vector<128x512xbf16>
    %cst_29 = arith.constant dense<0.000000e+00> : vector<8x512xf32>
    %58 = tpu.matmul %56, %57, %cst_29 {dimension_numbers = #tpu.dot_dimension_numbers<[1], [0], [0], [1], [0, 0, 1, 1], [], []>} : vector<8x128xbf16>, vector<128x512xbf16>, vector<8x512xf32> -> vector<8x512xf32>
    %59 = arith.addf %55, %58 : vector<8x512xf32>
    %c0_30 = arith.constant 0 : index
    %c0_31 = arith.constant 0 : index
    %60 = vector.load %arg9[%c0_30, %c0_31] : memref<1x512xf32, #tpu.memory_space<vmem>>, vector<1x512xf32>
    %61 = vector.broadcast %60 : vector<1x512xf32> to vector<8x512xf32>
    %62 = arith.addf %59, %61 : vector<8x512xf32>
    %63 = vector.extract_strided_slice %62 {offsets = [0, 0], sizes = [8, 128], strides = [1, 1]} : vector<8x512xf32> to vector<8x128xf32>
    %64 = arith.negf %63 : vector<8x128xf32>
    %65 = math.exp %64 : vector<8x128xf32>
    %cst_32 = arith.constant 1.000000e+00 : f32
    %66 = vector.broadcast %cst_32 : f32 to vector<8x128xf32>
    %67 = arith.addf %66, %65 : vector<8x128xf32>
    %68 = arith.divf %66, %67 : vector<8x128xf32>
    %69 = vector.extract_strided_slice %62 {offsets = [0, 128], sizes = [8, 128], strides = [1, 1]} : vector<8x512xf32> to vector<8x128xf32>
    %70 = arith.negf %69 : vector<8x128xf32>
    %71 = math.exp %70 : vector<8x128xf32>
    %cst_33 = arith.constant 1.000000e+00 : f32
    %72 = vector.broadcast %cst_33 : f32 to vector<8x128xf32>
    %73 = arith.addf %72, %71 : vector<8x128xf32>
    %74 = arith.divf %72, %73 : vector<8x128xf32>
    %75 = vector.extract_strided_slice %62 {offsets = [0, 256], sizes = [8, 128], strides = [1, 1]} : vector<8x512xf32> to vector<8x128xf32>
    %76 = math.tanh %75 : vector<8x128xf32>
    %77 = vector.extract_strided_slice %62 {offsets = [0, 384], sizes = [8, 128], strides = [1, 1]} : vector<8x512xf32> to vector<8x128xf32>
    %78 = arith.negf %77 : vector<8x128xf32>
    %79 = math.exp %78 : vector<8x128xf32>
    %cst_34 = arith.constant 1.000000e+00 : f32
    %80 = vector.broadcast %cst_34 : f32 to vector<8x128xf32>
    %81 = arith.addf %80, %79 : vector<8x128xf32>
    %82 = arith.divf %80, %81 : vector<8x128xf32>
    %83 = arith.mulf %74, %18 : vector<8x128xf32>
    %84 = arith.mulf %68, %76 : vector<8x128xf32>
    %85 = arith.addf %83, %84 : vector<8x128xf32>
    %86 = math.tanh %85 : vector<8x128xf32>
    %87 = arith.mulf %82, %86 : vector<8x128xf32>
    %88 = arith.truncf %87 : vector<8x128xf32> to vector<8x128xbf16>
    %c0_35 = arith.constant 0 : index
    %c0_36 = arith.constant 0 : index
    %89 = vector.load %arg10[%c0_35, %c0_36] : memref<128x128xbf16, #tpu.memory_space<vmem>>, vector<128x128xbf16>
    %cst_37 = arith.constant dense<0.000000e+00> : vector<8x128xf32>
    %90 = tpu.matmul %88, %89, %cst_37 {dimension_numbers = #tpu.dot_dimension_numbers<[1], [0], [0], [1], [0, 0, 1, 1], [], []>} : vector<8x128xbf16>, vector<128x128xbf16>, vector<8x128xf32> -> vector<8x128xf32>
    %c0_38 = arith.constant 0 : index
    %c0_39 = arith.constant 0 : index
    %91 = vector.load %arg11[%c0_38, %c0_39] : memref<1x128xf32, #tpu.memory_space<vmem>>, vector<1x128xf32>
    %92 = vector.broadcast %91 : vector<1x128xf32> to vector<8x128xf32>
    %93 = arith.addf %90, %92 : vector<8x128xf32>
    %c0_40 = arith.constant 0 : index
    %c0_41 = arith.constant 0 : index
    %c0_42 = arith.constant 0 : index
    %94 = vector.load %arg12[%c0_40, %c0_41, %c0_42] : memref<1x8x128xf32, #tpu.memory_space<vmem>>, vector<1x8x128xf32>
    %95 = vector.shape_cast %94 : vector<1x8x128xf32> to vector<8x128xf32>
    %96 = vector.shape_cast %93 : vector<8x128xf32> to vector<1x8x128xf32>
    tpu.vector_store %arg12[%c0_40, %c0_41, %c0_42], %96 {strides = array<i32>} : memref<1x8x128xf32, #tpu.memory_space<vmem>>, vector<1x8x128xf32>,
    %c0_43 = arith.constant 0 : index
    %c0_44 = arith.constant 0 : index
    %c0_45 = arith.constant 0 : index
    %97 = vector.load %arg13[%c0_43, %c0_44, %c0_45] : memref<2x8x128xf32, #tpu.memory_space<vmem>>, vector<1x8x128xf32>
    %98 = vector.shape_cast %97 : vector<1x8x128xf32> to vector<8x128xf32>
    %99 = vector.shape_cast %52 : vector<8x128xf32> to vector<1x8x128xf32>
    tpu.vector_store %arg13[%c0_43, %c0_44, %c0_45], %99 {strides = array<i32>} : memref<2x8x128xf32, #tpu.memory_space<vmem>>, vector<1x8x128xf32>,
    %c1_46 = arith.constant 1 : index
    %c0_47 = arith.constant 0 : index
    %c0_48 = arith.constant 0 : index
    %100 = vector.load %arg13[%c1_46, %c0_47, %c0_48] : memref<2x8x128xf32, #tpu.memory_space<vmem>>, vector<1x8x128xf32>
    %101 = vector.shape_cast %100 : vector<1x8x128xf32> to vector<8x128xf32>
    %102 = vector.shape_cast %87 : vector<8x128xf32> to vector<1x8x128xf32>
    tpu.vector_store %arg13[%c1_46, %c0_47, %c0_48], %102 {strides = array<i32>} : memref<2x8x128xf32, #tpu.memory_space<vmem>>, vector<1x8x128xf32>,
    %c0_49 = arith.constant 0 : index
    %c0_50 = arith.constant 0 : index
    %c0_51 = arith.constant 0 : index
    %103 = vector.load %arg14[%c0_49, %c0_50, %c0_51] : memref<2x8x128xf32, #tpu.memory_space<vmem>>, vector<1x8x128xf32>
    %104 = vector.shape_cast %103 : vector<1x8x128xf32> to vector<8x128xf32>
    %105 = vector.shape_cast %50 : vector<8x128xf32> to vector<1x8x128xf32>
    tpu.vector_store %arg14[%c0_49, %c0_50, %c0_51], %105 {strides = array<i32>} : memref<2x8x128xf32, #tpu.memory_space<vmem>>, vector<1x8x128xf32>,
    %c1_52 = arith.constant 1 : index
    %c0_53 = arith.constant 0 : index
    %c0_54 = arith.constant 0 : index
    %106 = vector.load %arg14[%c1_52, %c0_53, %c0_54] : memref<2x8x128xf32, #tpu.memory_space<vmem>>, vector<1x8x128xf32>
    %107 = vector.shape_cast %106 : vector<1x8x128xf32> to vector<8x128xf32>
    %108 = vector.shape_cast %85 : vector<8x128xf32> to vector<1x8x128xf32>
    tpu.vector_store %arg14[%c1_52, %c0_53, %c0_54], %108 {strides = array<i32>} : memref<2x8x128xf32, #tpu.memory_space<vmem>>, vector<1x8x128xf32>,
    return
  }
  func.func @transform_0(%arg0: i32) -> (i32, i32, i32) {
    %c0_i32 = arith.constant 0 : i32
    %c0_i32_0 = arith.constant 0 : i32
    %c0_i32_1 = arith.constant 0 : i32
    return %arg0, %c0_i32, %c0_i32_0 : i32, i32, i32
  }
  func.func @transform_1(%arg0: i32) -> (i32, i32, i32) {
    %c0_i32 = arith.constant 0 : i32
    %c0_i32_0 = arith.constant 0 : i32
    %c0_i32_1 = arith.constant 0 : i32
    %c0_i32_2 = arith.constant 0 : i32
    return %c0_i32, %c0_i32_0, %c0_i32_1 : i32, i32, i32
  }
  func.func @transform_2(%arg0: i32) -> (i32, i32, i32) {
    %c0_i32 = arith.constant 0 : i32
    %c0_i32_0 = arith.constant 0 : i32
    %c0_i32_1 = arith.constant 0 : i32
    %c0_i32_2 = arith.constant 0 : i32
    return %c0_i32, %c0_i32_0, %c0_i32_1 : i32, i32, i32
  }
  func.func @transform_3(%arg0: i32) -> (i32, i32) {
    %c0_i32 = arith.constant 0 : i32
    %c0_i32_0 = arith.constant 0 : i32
    %c0_i32_1 = arith.constant 0 : i32
    return %c0_i32, %c0_i32_0 : i32, i32
  }
  func.func @transform_4(%arg0: i32) -> (i32, i32) {
    %c0_i32 = arith.constant 0 : i32
    %c0_i32_0 = arith.constant 0 : i32
    %c0_i32_1 = arith.constant 0 : i32
    return %c0_i32, %c0_i32_0 : i32, i32
  }
  func.func @transform_5(%arg0: i32) -> (i32, i32) {
    %c0_i32 = arith.constant 0 : i32
    %c0_i32_0 = arith.constant 0 : i32
    %c0_i32_1 = arith.constant 0 : i32
    return %c0_i32, %c0_i32_0 : i32, i32
  }
  func.func @transform_6(%arg0: i32) -> (i32, i32) {
    %c0_i32 = arith.constant 0 : i32
    %c0_i32_0 = arith.constant 0 : i32
    %c0_i32_1 = arith.constant 0 : i32
    return %c0_i32, %c0_i32_0 : i32, i32
  }
  func.func @transform_7(%arg0: i32) -> (i32, i32) {
    %c0_i32 = arith.constant 0 : i32
    %c0_i32_0 = arith.constant 0 : i32
    %c0_i32_1 = arith.constant 0 : i32
    return %c0_i32, %c0_i32_0 : i32, i32
  }
  func.func @transform_8(%arg0: i32) -> (i32, i32) {
    %c0_i32 = arith.constant 0 : i32
    %c0_i32_0 = arith.constant 0 : i32
    %c0_i32_1 = arith.constant 0 : i32
    return %c0_i32, %c0_i32_0 : i32, i32
  }
  func.func @transform_9(%arg0: i32) -> (i32, i32) {
    %c0_i32 = arith.constant 0 : i32
    %c0_i32_0 = arith.constant 0 : i32
    %c0_i32_1 = arith.constant 0 : i32
    return %c0_i32, %c0_i32_0 : i32, i32
  }
  func.func @transform_10(%arg0: i32) -> (i32, i32) {
    %c0_i32 = arith.constant 0 : i32
    %c0_i32_0 = arith.constant 0 : i32
    %c0_i32_1 = arith.constant 0 : i32
    return %c0_i32, %c0_i32_0 : i32, i32
  }
  func.func @transform_11(%arg0: i32) -> (i32, i32, i32) {
    %c0_i32 = arith.constant 0 : i32
    %c0_i32_0 = arith.constant 0 : i32
    %c0_i32_1 = arith.constant 0 : i32
    return %arg0, %c0_i32, %c0_i32_0 : i32, i32, i32
  }
  func.func @transform_12(%arg0: i32) -> (i32, i32, i32) {
    %c0_i32 = arith.constant 0 : i32
    %c0_i32_0 = arith.constant 0 : i32
    %c0_i32_1 = arith.constant 0 : i32
    %c0_i32_2 = arith.constant 0 : i32
    return %c0_i32, %c0_i32_0, %c0_i32_1 : i32, i32, i32
  }
  func.func @transform_13(%arg0: i32) -> (i32, i32, i32) {
    %c0_i32 = arith.constant 0 : i32
    %c0_i32_0 = arith.constant 0 : i32
    %c0_i32_1 = arith.constant 0 : i32
    %c0_i32_2 = arith.constant 0 : i32
    return %c0_i32, %c0_i32_0, %c0_i32_1 : i32, i32, i32
  }
}

</mosaic_0001>

<bundles_post_ra>
// kernel: tpu_custom_call.1
= control target key start
LH: loop header
LB: loop body
LE: loop exit
PB: predicated region body
PF: predicated region fallthrough
CT: control target
= control target key end

     0   :  { %19 = vsyncpa [#allocation3], 0  ;;  %s2427_s0 = inlined_call_operand.vmem [shape: s32[1,8,1], index: 0, kind: input, shape index: {}]   ;;  %s2428_s1 = inlined_call_operand.hbm [shape: f32[2,8,128], index: 1, kind: input, shape index: {}]   ;;  %s2429_s2 = inlined_call_operand.vmem [shape: f32[2,8,128], index: 2, kind: input, shape index: {}]   ;;  %s2430_s3 = inlined_call_operand.hbm [shape: bf16[128,512], index: 3, kind: input, shape index: {}]   ;;  %s2431_s4 = inlined_call_operand.hbm [shape: bf16[128,512], index: 4, kind: input, shape index: {}]   ;;  %s2432_s5 = inlined_call_operand.vmem [shape: f32[1,512], index: 5, kind: input, shape index: {}]   ;;  %s2433_s6 = inlined_call_operand.hbm [shape: bf16[128,512], index: 6, kind: input, shape index: {}]   ;;  %s2434_s7 = inlined_call_operand.hbm [shape: bf16[128,512], index: 7, kind: input, shape index: {}]   ;;  %s2435_s8 = inlined_call_operand.vmem [shape: f32[1,512], index: 8, kind: input, shape index: {}]   ;;  %s2436_s9 = inlined_call_operand.hbm [shape: bf16[128,128], index: 9, kind: input, shape index: {}]   ;;  %s2437_s10 = inlined_call_operand.vmem [shape: f32[1,128], index: 10, kind: input, shape index: {}]   ;;  %s2438_s11 = inlined_call_operand.hbm [shape: f32[1,8,128], index: 11, kind: output, shape index: {0}]   ;;  %s2439_s12 = inlined_call_operand.hbm [shape: f32[2,8,128], index: 12, kind: output, shape index: {1}]   ;;  %s2440_s13 = inlined_call_operand.hbm [shape: f32[2,8,128], index: 13, kind: output, shape index: {2}]  }
   0x1   :  { %20 = vsyncpa [#allocation6], 0 }
   0x2   :  { %21 = vsyncpa [#allocation9], 0 }
   0x3   :  { %22 = vsyncpa [#allocation12], 0 }
   0x4   :  { %23 = vsyncpa [#allocation4], 0 }
   0x5   :  { %24 = vsyncpa [#allocation15], 0  ;;  %s2158_s25 = smov [#allocation5]   ;;  %s1948_s29 = scalar_lea.hbm %s2430_s3, 4096 }
   0x6   :  { %s46_s26 = sshll.u32 %s2158_s25, 4  ;;  %p1949_p0 = scmp.ne.s32.totalorder %s2430_s3, %s1948_s29  ;;  %s47_s26 = int_to_ptr.vmem [resolvable:$true] %s46_s26 }
   0x7   :  { %p1952_p1 = scmp.lt.u32.totalorder %s1948_s29, %s2430_s3 }
   0x9   :  { %p1954_p2 = pnand %p1952_p1, %p1949_p0 }
   0xb   :  { %1957 = shalt.err (!%p1954_p2)
}
   0xc   :  { %s1958_s17 = scalar_lea.vmem %s47_s26, 4096  ;;  %p1963_p4 = scmp.lt.s32.totalorder %s47_s26, %s47_s26 }
   0xd   :  { %p1959_p3 = scmp.ne.s32.totalorder %s47_s26, %s1958_s17  ;;  %p1964_p5 = scmp.lt.s32.totalorder %s1958_s17, %s1958_s17 }
   0xf   :  { %p1965_p6 = por %p1964_p5, %p1963_p4 }
  0x11   :  { %p1966_p7 = pnand %p1965_p6, %p1959_p3 }
  0x13   :  { %1969 = shalt.err (!%p1966_p7)
}
  0x14   :  { %s2159_s18 = smov 256   ;;  %s2160_s19 = smov 16  }
  0x15   :  { %52 = dma.hbm_to_vmem [thread:$0]  %s2430_s3, 4096, %s47_s26, [#allocation6], %s2159_s18, %s2159_s18, %s2160_s19  }
  0x16   :  { %s2161_s22 = smov [#allocation8]   ;;  %s2162_s24 = smov [#allocation2]  }
  0x17   :  { %s72_s23 = sshll.u32 %s2161_s22, 4  ;;  %s32_s25 = sshll.u32 %s2162_s24, 4  ;;  %s73_s23 = int_to_ptr.vmem [resolvable:$true] %s72_s23  ;;  %s33_s25 = int_to_ptr.vmem [resolvable:$true] %s32_s25 }
  0x18   :  { %s1970_s29 = scalar_lea.hbm %s2433_s6, 4096 }
  0x19   :  { %p1971_p8 = scmp.ne.s32.totalorder %s2433_s6, %s1970_s29  ;;  %p1974_p9 = scmp.lt.u32.totalorder %s1970_s29, %s2433_s6 }
  0x1b   :  { %p1976_p10 = pnand %p1974_p9, %p1971_p8 }
  0x1d   :  { %1979 = shalt.err (!%p1976_p10)
}
  0x1e   :  { %s1980_s3 = scalar_lea.vmem %s73_s23, 4096  ;;  %p1985_p12 = scmp.lt.s32.totalorder %s73_s23, %s73_s23 }
  0x1f   :  { %p1981_p11 = scmp.ne.s32.totalorder %s73_s23, %s1980_s3  ;;  %p1986_p13 = scmp.lt.s32.totalorder %s1980_s3, %s1980_s3 }
  0x21   :  { %p1987_p0 = por %p1986_p13, %p1985_p12 }
  0x23   :  { %p1988_p1 = pnand %p1987_p0, %p1981_p11 }
  0x25   :  { %1991 = shalt.err (!%p1988_p1)
}
  0x26   :  { %78 = dma.hbm_to_vmem [thread:$0]  %s2433_s6, 4096, %s73_s23, [#allocation9], %s2159_s18, %s2159_s18, %s2160_s19  }
  0x27   :  { %s1992_s22 = scalar_lea.hbm %s2428_s1, 256 }
  0x28   :  { %p1993_p2 = scmp.ne.s32.totalorder %s2428_s1, %s1992_s22  ;;  %p1996_p3 = scmp.lt.u32.totalorder %s1992_s22, %s2428_s1 }
  0x2a   :  { %p1998_p4 = pnand %p1996_p3, %p1993_p2 }
  0x2c   :  { %2001 = shalt.err (!%p1998_p4)
}
  0x2d   :  { %s2002_s30 = scalar_lea.vmem %s33_s25, 256  ;;  %p2007_p6 = scmp.lt.s32.totalorder %s33_s25, %s33_s25 }
  0x2e   :  { %p2003_p5 = scmp.ne.s32.totalorder %s33_s25, %s2002_s30  ;;  %p2008_p7 = scmp.lt.s32.totalorder %s2002_s30, %s2002_s30 }
  0x30   :  { %p2009_p8 = por %p2008_p7, %p2007_p6 }
  0x32   :  { %p2010_p9 = pnand %p2009_p8, %p2003_p5 }
  0x34   :  { %2013 = shalt.err (!%p2010_p9)
}
  0x35   :  { %s2163_s6 = smov 128   ;;  %s2164_s23 = smov 8  }
  0x36   :  { %38 = dma.hbm_to_vmem [thread:$0]  %s2428_s1, 256, %s33_s25, [#allocation3], %s2163_s6, %s2163_s6, %s2164_s23  }
  0x37   :  { %s2165_s16 = smov [#allocation7]   ;;  %s2166_s26 = smov [#allocation10]  }
  0x38   :  { %s58_s3 = sshll.u32 %s2165_s16, 4  ;;  %s84_s17 = sshll.u32 %s2166_s26, 4  ;;  %s59_s3 = int_to_ptr.vmem [resolvable:$true] %s58_s3  ;;  %s85_s17 = int_to_ptr.vmem [resolvable:$true] %s84_s17 }
  0x39   :  { %s2014_s22 = scalar_lea.hbm %s2431_s4, 4096 }
  0x3a   :  { %p2015_p10 = scmp.ne.s32.totalorder %s2431_s4, %s2014_s22  ;;  %p2018_p11 = scmp.lt.u32.totalorder %s2014_s22, %s2431_s4 }
  0x3c   :  { %p2020_p12 = pnand %p2018_p11, %p2015_p10 }
  0x3e   :  { %2023 = shalt.err (!%p2020_p12)
}
  0x3f   :  { %s2024_s1 = scalar_lea.vmem %s59_s3, 4096  ;;  %p2029_p0 = scmp.lt.s32.totalorder %s59_s3, %s59_s3 }
  0x40   :  { %p2025_p13 = scmp.ne.s32.totalorder %s59_s3, %s2024_s1  ;;  %p2030_p1 = scmp.lt.s32.totalorder %s2024_s1, %s2024_s1 }
  0x42   :  { %p2031_p2 = por %p2030_p1, %p2029_p0 }
  0x44   :  { %p2032_p3 = pnand %p2031_p2, %p2025_p13 }
  0x46   :  { %2035 = shalt.err (!%p2032_p3)
}
  0x47   :  { %64 = dma.hbm_to_vmem [thread:$0]  %s2431_s4, 4096, %s59_s3, [#allocation6], %s2159_s18, %s2159_s18, %s2160_s19  }
  0x48   :  { %s2036_s16 = scalar_lea.hbm %s2434_s7, 4096 }
  0x49   :  { %p2037_p4 = scmp.ne.s32.totalorder %s2434_s7, %s2036_s16  ;;  %p2040_p5 = scmp.lt.u32.totalorder %s2036_s16, %s2434_s7 }
  0x4b   :  { %p2042_p6 = pnand %p2040_p5, %p2037_p4 }
  0x4d   :  { %2045 = shalt.err (!%p2042_p6)
}
  0x4e   :  { %s2046_s24 = scalar_lea.vmem %s85_s17, 4096  ;;  %p2051_p8 = scmp.lt.s32.totalorder %s85_s17, %s85_s17 }
  0x4f   :  { %p2047_p7 = scmp.ne.s32.totalorder %s85_s17, %s2046_s24  ;;  %p2052_p9 = scmp.lt.s32.totalorder %s2046_s24, %s2046_s24 }
  0x51   :  { %p2053_p10 = por %p2052_p9, %p2051_p8 }
  0x53   :  { %p2054_p11 = pnand %p2053_p10, %p2047_p7 }
  0x55   :  { %2057 = shalt.err (!%p2054_p11)
}
  0x56   :  { %90 = dma.hbm_to_vmem [thread:$0]  %s2434_s7, 4096, %s85_s17, [#allocation9], %s2159_s18, %s2159_s18, %s2160_s19  }
  0x57   :  { %s2167_s27 = smov [#allocation11]   ;;  %s2058_s25 = scalar_lea.hbm %s2436_s9, 1024 }
  0x58   :  { %s98_s28 = sshll.u32 %s2167_s27, 4  ;;  %p2059_p12 = scmp.ne.s32.totalorder %s2436_s9, %s2058_s25  ;;  %s99_s28 = int_to_ptr.vmem [resolvable:$true] %s98_s28 }
  0x59   :  { %p2062_p13 = scmp.lt.u32.totalorder %s2058_s25, %s2436_s9 }
  0x5b   :  { %p2064_p0 = pnand %p2062_p13, %p2059_p12 }
  0x5d   :  { %2067 = shalt.err (!%p2064_p0)
}
  0x5e   :  { %s2068_s26 = scalar_lea.vmem %s99_s28, 1024  ;;  %p2073_p2 = scmp.lt.s32.totalorder %s99_s28, %s99_s28 }
  0x5f   :  { %p2069_p1 = scmp.ne.s32.totalorder %s99_s28, %s2068_s26  ;;  %p2074_p3 = scmp.lt.s32.totalorder %s2068_s26, %s2068_s26 }
  0x61   :  { %p2075_p4 = por %p2074_p3, %p2073_p2 }
  0x63   :  { %p2076_p5 = pnand %p2075_p4, %p2069_p1 }
  0x65   :  { %2079 = shalt.err (!%p2076_p5)
}
  0x66   :  { %s2168_s7 = smov 64   ;;  %s2169_s18 = smov 4  }
  0x67   :  { %104 = dma.hbm_to_vmem [thread:$0]  %s2436_s9, 1024, %s99_s28, [#allocation12], %s2168_s7, %s2168_s7, %s2169_s18  }
  0x68   :  { %2146 = dma.done.wait [#allocation3], 256  }
  0x69   :  { %2147 = vsyncadd [#allocation3], 4294967040 }
  0x6a   :  { %2148 = dma.done.wait [#allocation6], 8192  }
  0x6b   :  { %2149 = vsyncadd [#allocation6], 4294959104 }
  0x6c   :  { %2150 = dma.done.wait [#allocation9], 8192  }
  0x6d   :  { %2151 = vsyncadd [#allocation9], 4294959104 }
  0x6e   :  { %2152 = dma.done.wait [#allocation12], 1024  }
  0x6f   :  { %2153 = vsyncadd [#allocation12], 4294966272  ;;  %v2170_v0 = vmov 0   ;;  %v138_v1 = vld [vmem:[%s2427_s0] sm:$0xff]  ;;  %v1716_v2 = vld [vmem:[#allocation7 + $0x4] ss:$16 sps:$4 sm:$0xff]  }
  0x70   :  { %1715 = vset.pattern.permute.xlu0 %v2170_v0  ;;  %411 = vmatprep.mubr.bf16.mxu0 %v2170_v0  ;;  %v1718_v3 = vld [vmem:[#allocation7] ss:$16 sps:$4 sm:$0xff]   ;;  %v1719_v4 = vld [vmem:[#allocation7 + $0xc] ss:$16 sps:$4 sm:$0xff]   ;;  %v1721_v5 = vld [vmem:[#allocation7 + $0x8] ss:$16 sps:$4 sm:$0xff]  }
  0x71   :  { %452 = vmatprep.mubr.bf16.mxu1 %v2170_v0  ;;  %142 = vperm.xlu0 %1715, %v138_v1   ;;  %v1722_v6 = vld [vmem:[#allocation7 + $0x24] ss:$16 sps:$4 sm:$0xff]   ;;  %v1724_v7 = vld [vmem:[#allocation7 + $0x20] ss:$16 sps:$4 sm:$0xff]   ;;  %v1725_v8 = vld [vmem:[#allocation7 + $0x2c] ss:$16 sps:$4 sm:$0xff]  }
  0x72   :  { %379 = vmatprep.subr.bf16.mxu0 %v1716_v2  ;;  %420 = vmatprep.subr.bf16.mxu1 %v1719_v4  ;;  %v1727_v9 = vld [vmem:[#allocation7 + $0x28] ss:$16 sps:$4 sm:$0xff]   ;;  %v1728_v10 = vld [vmem:[#allocation7 + $0x44] ss:$16 sps:$4 sm:$0xff]   ;;  %v1731_v11 = vld [vmem:[#allocation7 + $0x4c] ss:$16 sps:$4 sm:$0xff]  }
  0x73   :  { %380 = vmatpush1.bf16.msra.mxu0 %v1718_v3  ;;  %421 = vmatpush1.bf16.msra.mxu1 %v1721_v5  ;;  %v1730_v12 = vld [vmem:[#allocation7 + $0x40] ss:$16 sps:$4 sm:$0xff]   ;;  %v1733_v13 = vld [vmem:[#allocation7 + $0x48] ss:$16 sps:$4 sm:$0xff]   ;;  %v1734_v14 = vld [vmem:[#allocation7 + $0x64] ss:$16 sps:$4 sm:$0xff]   ;;  %v139_v5 = vlaneseq }
  0x74   :  { %381 = vmatprep.subr.bf16.mxu0 %v1722_v6  ;;  %422 = vmatprep.subr.bf16.mxu1 %v1725_v8  ;;  %v1737_v15 = vld [vmem:[#allocation7 + $0x6c] ss:$16 sps:$4 sm:$0xff]   ;;  %v1736_v16 = vld [vmem:[#allocation7 + $0x60] ss:$16 sps:$4 sm:$0xff]   ;;  %v1739_v17 = vld [vmem:[#allocation7 + $0x68] ss:$16 sps:$4 sm:$0xff]  }
  0x75   :  { %v1740_v18 = vld [vmem:[#allocation7 + $0x84] ss:$16 sps:$4 sm:$0xff]   ;;  %v1743_v19 = vld [vmem:[#allocation7 + $0x8c] ss:$16 sps:$4 sm:$0xff]   ;;  %v1742_v20 = vld [vmem:[#allocation7 + $0x80] ss:$16 sps:$4 sm:$0xff]  }
  0x76   :  { %v1745_v21 = vld [vmem:[#allocation7 + $0x88] ss:$16 sps:$4 sm:$0xff]   ;;  %v1746_v22 = vld [vmem:[#allocation7 + $0xa4] ss:$16 sps:$4 sm:$0xff]   ;;  %v1749_v23 = vld [vmem:[#allocation7 + $0xac] ss:$16 sps:$4 sm:$0xff]  }
  0x77   :  { %382 = vmatpush1.bf16.msra.mxu0 %v1724_v7  ;;  %423 = vmatpush1.bf16.msra.mxu1 %v1727_v9  ;;  %v1748_v24 = vld [vmem:[#allocation7 + $0xa0] ss:$16 sps:$4 sm:$0xff]   ;;  %v1751_v25 = vld [vmem:[#allocation7 + $0xa8] ss:$16 sps:$4 sm:$0xff]   ;;  %v1752_v26 = vld [vmem:[#allocation7 + $0xc4] ss:$16 sps:$4 sm:$0xff]  }
  0x78   :  { %383 = vmatprep.subr.bf16.mxu0 %v1728_v10  ;;  %424 = vmatprep.subr.bf16.mxu1 %v1731_v11  ;;  %v1755_v27 = vld [vmem:[#allocation7 + $0xcc] ss:$16 sps:$4 sm:$0xff]   ;;  %v1754_v28 = vld [vmem:[#allocation7 + $0xc0] ss:$16 sps:$4 sm:$0xff]   ;;  %v1757_v29 = vld [vmem:[#allocation7 + $0xc8] ss:$16 sps:$4 sm:$0xff]  }
  0x79   :  { %v1758_v30 = vld [vmem:[#allocation7 + $0xe4] ss:$16 sps:$4 sm:$0xff]   ;;  %v1761_v31 = vld [vmem:[#allocation7 + $0xec] ss:$16 sps:$4 sm:$0xff]   ;;  %v1760_v32 = vld [vmem:[#allocation7 + $0xe0] ss:$16 sps:$4 sm:$0xff]  }
  0x7a   :  { %v130_v33 = vld [vmem:[#allocation2] sm:$0xff]  ;;  %v1763_v34 = vld [vmem:[#allocation7 + $0xe8] ss:$16 sps:$4 sm:$0xff]   ;;  %v1769_v36 = vld [vmem:[#allocation5 + $0xc] ss:$16 sps:$4 sm:$0xff]   ;;  %v140_v8 = vand.u32 127, %v139_v5 }
  0x7b   :  { %384 = vmatpush1.bf16.msra.mxu0 %v1730_v12  ;;  %425 = vmatpush1.bf16.msra.mxu1 %v1733_v13  ;;  %v1766_v35 = vld [vmem:[#allocation5 + $0x4] ss:$16 sps:$4 sm:$0xff]   ;;  %v186_v37 = vpack.c.bf16 %v130_v33, %v130_v33  ;;  %v1764_v38 = vld [vmem:[#allocation5] ss:$16 sps:$4 sm:$0xff]   ;;  %v1767_v39 = vld [vmem:[#allocation5 + $0x8] ss:$16 sps:$4 sm:$0xff]  }
  0x7c   :  { %385 = vmatprep.subr.bf16.mxu0 %v1734_v14  ;;  %426 = vmatprep.subr.bf16.mxu1 %v1737_v15  ;;  %v1772_v40 = vld [vmem:[#allocation5 + $0x24] ss:$16 sps:$4 sm:$0xff]   ;;  %v1775_v41 = vld [vmem:[#allocation5 + $0x2c] ss:$16 sps:$4 sm:$0xff]   ;;  %v1770_v42 = vld [vmem:[#allocation5 + $0x20] ss:$16 sps:$4 sm:$0xff]  }
  0x7d   :  { %v1773_v43 = vld [vmem:[#allocation5 + $0x28] ss:$16 sps:$4 sm:$0xff]   ;;  %v1778_v44 = vld [vmem:[#allocation5 + $0x44] ss:$16 sps:$4 sm:$0xff]   ;;  %v1781_v45 = vld [vmem:[#allocation5 + $0x4c] ss:$16 sps:$4 sm:$0xff]  }
  0x7e   :  { %v1776_v46 = vld [vmem:[#allocation5 + $0x40] ss:$16 sps:$4 sm:$0xff]   ;;  %v1779_v47 = vld [vmem:[#allocation5 + $0x48] ss:$16 sps:$4 sm:$0xff]   ;;  %v1784_v48 = vld [vmem:[#allocation5 + $0x64] ss:$16 sps:$4 sm:$0xff]  }
  0x7f   :  { %386 = vmatpush1.bf16.msra.mxu0 %v1736_v16  ;;  %427 = vmatpush1.bf16.msra.mxu1 %v1739_v17  ;;  %v1782_v49 = vld [vmem:[#allocation5 + $0x60] ss:$16 sps:$4 sm:$0xff]   ;;  %v1787_v50 = vld [vmem:[#allocation5 + $0x6c] ss:$16 sps:$4 sm:$0xff]   ;;  %v1785_v51 = vld [vmem:[#allocation5 + $0x68] ss:$16 sps:$4 sm:$0xff]  }
  0x80   :  { %387 = vmatprep.subr.bf16.mxu0 %v1740_v18  ;;  %428 = vmatprep.subr.bf16.mxu1 %v1743_v19  ;;  %v1790_v52 = vld [vmem:[#allocation5 + $0x84] ss:$16 sps:$4 sm:$0xff]   ;;  %v1793_v53 = vld [vmem:[#allocation5 + $0x8c] ss:$16 sps:$4 sm:$0xff]   ;;  %v1788_v54 = vld [vmem:[#allocation5 + $0x80] ss:$16 sps:$4 sm:$0xff]  }
  0x81   :  { %v1791_v55 = vld [vmem:[#allocation5 + $0x88] ss:$16 sps:$4 sm:$0xff]   ;;  %v1796_v56 = vld [vmem:[#allocation5 + $0xa4] ss:$16 sps:$4 sm:$0xff]   ;;  %v1799_v57 = vld [vmem:[#allocation5 + $0xac] ss:$16 sps:$4 sm:$0xff]  }
  0x82   :  { %v1794_v58 = vld [vmem:[#allocation5 + $0xa0] ss:$16 sps:$4 sm:$0xff]   ;;  %v1797_v59 = vld [vmem:[#allocation5 + $0xa8] ss:$16 sps:$4 sm:$0xff]   ;;  %v1802_v60 = vld [vmem:[#allocation5 + $0xc4] ss:$16 sps:$4 sm:$0xff]  }
  0x83   :  { %388 = vmatpush1.bf16.msra.mxu0 %v1742_v20  ;;  %429 = vmatpush1.bf16.msra.mxu1 %v1745_v21  ;;  %v1805_v61 = vld [vmem:[#allocation5 + $0xcc] ss:$16 sps:$4 sm:$0xff]   ;;  %v1800_v62 = vld [vmem:[#allocation5 + $0xc0] ss:$16 sps:$4 sm:$0xff]   ;;  %v1803_v63 = vld [vmem:[#allocation5 + $0xc8] ss:$16 sps:$4 sm:$0xff]  }
  0x84   :  { %389 = vmatprep.subr.bf16.mxu0 %v1746_v22  ;;  %430 = vmatprep.subr.bf16.mxu1 %v1749_v23  ;;  %v1808_v1 = vld [vmem:[#allocation5 + $0xe4] ss:$16 sps:$4 sm:$0xff]   ;;  %v1811_v2 = vld [vmem:[#allocation5 + $0xec] ss:$16 sps:$4 sm:$0xff]   ;;  %v1806_v3 = vld [vmem:[#allocation5 + $0xe0] ss:$16 sps:$4 sm:$0xff]  }
  0x85   :  { %v1809_v4 = vld [vmem:[#allocation5 + $0xe8] ss:$16 sps:$4 sm:$0xff]   ;;  %v1814_v6 = vld [vmem:[#allocation10 + $0x4] ss:$16 sps:$4 sm:$0xff]   ;;  %v1817_v7 = vld [vmem:[#allocation10 + $0xc] ss:$16 sps:$4 sm:$0xff]  }
  0x86   :  { %v1812_v10 = vld [vmem:[#allocation10] ss:$16 sps:$4 sm:$0xff]   ;;  %v1815_v11 = vld [vmem:[#allocation10 + $0x8] ss:$16 sps:$4 sm:$0xff]   ;;  %v1820_v12 = vld [vmem:[#allocation10 + $0x24] ss:$16 sps:$4 sm:$0xff]  }
  0x87   :  { %390 = vmatpush1.bf16.msra.mxu0 %v1748_v24  ;;  %431 = vmatpush1.bf16.msra.mxu1 %v1751_v25  ;;  %v1823_v13 = vld [vmem:[#allocation10 + $0x2c] ss:$16 sps:$4 sm:$0xff]   ;;  %v2171_v14 = vmov 1.0|1.0   ;;  %v1818_v15 = vld [vmem:[#allocation10 + $0x20] ss:$16 sps:$4 sm:$0xff]  }
  0x88   :  { %391 = vmatprep.subr.bf16.mxu0 %v1752_v26  ;;  %432 = vmatprep.subr.bf16.mxu1 %v1755_v27  ;;  %v1821_v16 = vld [vmem:[#allocation10 + $0x28] ss:$16 sps:$4 sm:$0xff]   ;;  %v1826_v17 = vld [vmem:[#allocation10 + $0x44] ss:$16 sps:$4 sm:$0xff]   ;;  %v1829_v18 = vld [vmem:[#allocation10 + $0x4c] ss:$16 sps:$4 sm:$0xff]  }
  0x89   :  { %v1824_v19 = vld [vmem:[#allocation10 + $0x40] ss:$16 sps:$4 sm:$0xff]   ;;  %v1827_v20 = vld [vmem:[#allocation10 + $0x48] ss:$16 sps:$4 sm:$0xff]   ;;  %v1832_v21 = vld [vmem:[#allocation10 + $0x64] ss:$16 sps:$4 sm:$0xff]  }
  0x8a   :  { %v1835_v22 = vld [vmem:[#allocation10 + $0x6c] ss:$16 sps:$4 sm:$0xff]   ;;  %v1830_v23 = vld [vmem:[#allocation10 + $0x60] ss:$16 sps:$4 sm:$0xff]   ;;  %v1833_v24 = vld [vmem:[#allocation10 + $0x68] ss:$16 sps:$4 sm:$0xff]  }
  0x8b   :  { %392 = vmatpush1.bf16.msra.mxu0 %v1754_v28  ;;  %433 = vmatpush1.bf16.msra.mxu1 %v1757_v29  ;;  %v1838_v25 = vld [vmem:[#allocation10 + $0x84] ss:$16 sps:$4 sm:$0xff]   ;;  %v1836_v26 = vld [vmem:[#allocation10 + $0x80] ss:$16 sps:$4 sm:$0xff]   ;;  %v1841_v27 = vld [vmem:[#allocation10 + $0x8c] ss:$16 sps:$4 sm:$0xff]  }
  0x8c   :  { %393 = vmatprep.subr.bf16.mxu0 %v1758_v30  ;;  %434 = vmatprep.subr.bf16.mxu1 %v1761_v31  ;;  %v1839_v28 = vld [vmem:[#allocation10 + $0x88] ss:$16 sps:$4 sm:$0xff]   ;;  %v1844_v29 = vld [vmem:[#allocation10 + $0xa4] ss:$16 sps:$4 sm:$0xff]   ;;  %v1842_v30 = vld [vmem:[#allocation10 + $0xa0] ss:$16 sps:$4 sm:$0xff]  }
  0x8d   :  { %v1847_v31 = vld [vmem:[#allocation10 + $0xac] ss:$16 sps:$4 sm:$0xff]   ;;  %v1850_v33 = vld [vmem:[#allocation10 + $0xc4] ss:$16 sps:$4 sm:$0xff]   ;;  %vm2173_vm2 = vmmov 0   ;;  %s2174_s27 = smov [#allocation14]  }
  0x8e   :  { %s1485_s28 = sshll.u32 %s2174_s27, 4  ;;  %s1486_s28 = int_to_ptr.vmem [resolvable:$true] %s1485_s28 }
  0x8f   :  { %394 = vmatpush1.bf16.msra.mxu0 %v1760_v32  ;;  %435 = vmatpush1.bf16.msra.mxu1 %v1763_v34  ;;  %v1845_v32 = vld [vmem:[#allocation10 + $0xa8] ss:$16 sps:$4 sm:$0xff]   ;;  %v1848_v34 = vld [vmem:[#allocation10 + $0xc0] ss:$16 sps:$4 sm:$0xff]   ;;  %s2080_s29 = scalar_lea.vmem %s1486_s28, 256  ;;  %p2085_p7 = scmp.lt.s32.totalorder %s1486_s28, %s1486_s28 }
  0x90   :  { %621 = vmatprep.subr.bf16.mxu0 %v1766_v35  ;;  %662 = vmatprep.subr.bf16.mxu1 %v1769_v36  ;;  %v1853_v35 = vld [vmem:[#allocation10 + $0xcc] ss:$16 sps:$4 sm:$0xff]   ;;  %v1851_v36 = vld [vmem:[#allocation10 + $0xc8] ss:$16 sps:$4 sm:$0xff]   ;;  %p2081_p6 = scmp.ne.s32.totalorder %s1486_s28, %s2080_s29  ;;  %p2086_p8 = scmp.lt.s32.totalorder %s2080_s29, %s2080_s29 }
  0x92   :  { %412 = vmatmul.mubr.bf16.vlgmr.msra.gmra.mrb[0].mxu0 %v186_v37  ;;  %453 = vmatmul.mubr.bf16.vlgmr.msra.gmra.mrb[0].mxu1 %v186_v37  ;;  %v1856_v37 = vld [vmem:[#allocation10 + $0xe4] ss:$16 sps:$4 sm:$0xff]   ;;  %p2087_p9 = por %p2086_p8, %p2085_p7 }
  0x93   :  { %622 = vmatpush1.bf16.msra.mxu0 %v1764_v38  ;;  %663 = vmatpush1.bf16.msra.mxu1 %v1767_v39  ;;  %v1854_v38 = vld [vmem:[#allocation10 + $0xe0] ss:$16 sps:$4 sm:$0xff]   ;;  %v1859_v39 = vld [vmem:[#allocation10 + $0xec] ss:$16 sps:$4 sm:$0xff]  }
  0x94   :  { %623 = vmatprep.subr.bf16.mxu0 %v1772_v40  ;;  %664 = vmatprep.subr.bf16.mxu1 %v1775_v41  ;;  %v1857_v40 = vld [vmem:[#allocation10 + $0xe8] ss:$16 sps:$4 sm:$0xff]   ;;  %p2088_p10 = pnand %p2087_p9, %p2081_p6 }
  0x95   :  { %653 = vmatprep.mubr.bf16.mxu0 %v2170_v0  ;;  %694 = vmatprep.mubr.bf16.mxu1 %v2170_v0  ;;  %v131_v41 = vld [vmem:[#allocation2 + $0x8] sm:$0xff] }
  0x97   :  { %624 = vmatpush1.bf16.msra.mxu0 %v1770_v42  ;;  %665 = vmatpush1.bf16.msra.mxu1 %v1773_v43  ;;  %v786_v42 = vpack.c.bf16 %v131_v41, %v131_v41  ;;  %v1862_v43 = vld [vmem:[#allocation8 + $0x4] ss:$16 sps:$4 sm:$0xff]  }
  0x98   :  { %625 = vmatprep.subr.bf16.mxu0 %v1778_v44  ;;  %666 = vmatprep.subr.bf16.mxu1 %v1781_v45  ;;  %v1865_v44 = vld [vmem:[#allocation8 + $0xc] ss:$16 sps:$4 sm:$0xff]   ;;  %v1860_v45 = vld [vmem:[#allocation8] ss:$16 sps:$4 sm:$0xff]  }
  0x9b   :  { %626 = vmatpush1.bf16.msra.mxu0 %v1776_v46  ;;  %667 = vmatpush1.bf16.msra.mxu1 %v1779_v47  ;;  %v1863_v46 = vld [vmem:[#allocation8 + $0x8] ss:$16 sps:$4 sm:$0xff]   ;;  %v1868_v47 = vld [vmem:[#allocation8 + $0x24] ss:$16 sps:$4 sm:$0xff]  }
  0x9c   :  { %627 = vmatprep.subr.bf16.mxu0 %v1784_v48  ;;  %668 = vmatprep.subr.bf16.mxu1 %v1787_v50  ;;  %v1871_v48 = vld [vmem:[#allocation8 + $0x2c] ss:$16 sps:$4 sm:$0xff]   ;;  %v1869_v50 = vld [vmem:[#allocation8 + $0x28] ss:$16 sps:$4 sm:$0xff]  }
  0x9f   :  { %628 = vmatpush1.bf16.msra.mxu0 %v1782_v49  ;;  %669 = vmatpush1.bf16.msra.mxu1 %v1785_v51  ;;  %v1866_v49 = vld [vmem:[#allocation8 + $0x20] ss:$16 sps:$4 sm:$0xff]   ;;  %v1874_v51 = vld [vmem:[#allocation8 + $0x44] ss:$16 sps:$4 sm:$0xff]  }
  0xa0   :  { %629 = vmatprep.subr.bf16.mxu0 %v1790_v52  ;;  %670 = vmatprep.subr.bf16.mxu1 %v1793_v53  ;;  %v1877_v52 = vld [vmem:[#allocation8 + $0x4c] ss:$16 sps:$4 sm:$0xff]   ;;  %v1872_v53 = vld [vmem:[#allocation8 + $0x40] ss:$16 sps:$4 sm:$0xff]  }
  0xa3   :  { %630 = vmatpush1.bf16.msra.mxu0 %v1788_v54  ;;  %671 = vmatpush1.bf16.msra.mxu1 %v1791_v55  ;;  %v1875_v54 = vld [vmem:[#allocation8 + $0x48] ss:$16 sps:$4 sm:$0xff]   ;;  %v1880_v55 = vld [vmem:[#allocation8 + $0x64] ss:$16 sps:$4 sm:$0xff]  }
  0xa4   :  { %631 = vmatprep.subr.bf16.mxu0 %v1796_v56  ;;  %672 = vmatprep.subr.bf16.mxu1 %v1799_v57  ;;  %v1883_v56 = vld [vmem:[#allocation8 + $0x6c] ss:$16 sps:$4 sm:$0xff]   ;;  %v1878_v57 = vld [vmem:[#allocation8 + $0x60] ss:$16 sps:$4 sm:$0xff]  }
  0xa7   :  { %632 = vmatpush1.bf16.msra.mxu0 %v1794_v58  ;;  %673 = vmatpush1.bf16.msra.mxu1 %v1797_v59  ;;  %v1881_v58 = vld [vmem:[#allocation8 + $0x68] ss:$16 sps:$4 sm:$0xff]  }
  0xa8   :  { %633 = vmatprep.subr.bf16.mxu0 %v1802_v60  ;;  %674 = vmatprep.subr.bf16.mxu1 %v1805_v61 }
  0xab   :  { %634 = vmatpush1.bf16.msra.mxu0 %v1800_v62  ;;  %675 = vmatpush1.bf16.msra.mxu1 %v1803_v63  ;;  %v1886_v63 = vld [vmem:[#allocation8 + $0x84] ss:$16 sps:$4 sm:$0xff]  }
  0xac   :  { %635 = vmatprep.subr.bf16.mxu0 %v1808_v1  ;;  %676 = vmatprep.subr.bf16.mxu1 %v1811_v2  ;;  %v1889_v1 = vld [vmem:[#allocation8 + $0x8c] ss:$16 sps:$4 sm:$0xff]  }
  0xaf   :  { %636 = vmatpush1.bf16.msra.mxu0 %v1806_v3  ;;  %677 = vmatpush1.bf16.msra.mxu1 %v1809_v4  ;;  %v1884_v4 = vld [vmem:[#allocation8 + $0x80] ss:$16 sps:$4 sm:$0xff]  }
  0xb0   :  { %979 = vmatprep.subr.bf16.mxu0 %v1814_v6  ;;  %1020 = vmatprep.subr.bf16.mxu1 %v1817_v7  ;;  %v1887_v6 = vld [vmem:[#allocation8 + $0x88] ss:$16 sps:$4 sm:$0xff]  }
  0xf0   :  { %v143_v9 = vpop.permute.xlu0 %142 }
  0xf1   :  { %vm144_vm0 = vcmp.eq.s32.totalorder %v140_v8, %v143_v9  ;;  %v1892_v8 = vld [vmem:[#allocation8 + $0xa4] ss:$16 sps:$4 sm:$0xff]   ;;  %v1890_v9 = vld [vmem:[#allocation8 + $0xa0] ss:$16 sps:$4 sm:$0xff]  }
  0xf2   :  { %vm1584_vm1 = vmpackc.low %vm144_vm0, %vm144_vm0 }
  0xf3   :  { %1585 = vmatmul.mubr.msk.bf16.vlgmr.msra.gmra.mrb[4].mxu0 %vm1584_vm1, %v2171_v14  ;;  %1587 = vmatmul.mubr.msk.bf16.vlgmr.msra.gmra.mrb[4].mxu1 %vm1584_vm1, %v2171_v14  ;;  %v1896_v14 = vld [vmem:[#allocation8 + $0xc0] ss:$16 sps:$4 sm:$0xff]  }
  0xf4   :  { %980 = vmatpush1.bf16.msra.mxu0 %v1812_v10  ;;  %1021 = vmatpush1.bf16.msra.mxu1 %v1815_v11  ;;  %v1895_v10 = vld [vmem:[#allocation8 + $0xac] ss:$16 sps:$4 sm:$0xff]   ;;  %v1893_v11 = vld [vmem:[#allocation8 + $0xa8] ss:$16 sps:$4 sm:$0xff]  }
  0xf5   :  { %981 = vmatprep.subr.bf16.mxu0 %v1820_v12  ;;  %1022 = vmatprep.subr.bf16.mxu1 %v1823_v13  ;;  %v1898_v12 = vld [vmem:[#allocation8 + $0xc4] ss:$16 sps:$4 sm:$0xff]   ;;  %v1901_v13 = vld [vmem:[#allocation8 + $0xcc] ss:$16 sps:$4 sm:$0xff]  }
  0xf6   :  { %1011 = vmatprep.mubr.bf16.mxu0 %v2170_v0  ;;  %1052 = vmatprep.mubr.bf16.mxu1 %v2170_v0 }
  0xf8   :  { %982 = vmatpush1.bf16.msra.mxu0 %v1818_v15  ;;  %1023 = vmatpush1.bf16.msra.mxu1 %v1821_v16  ;;  %v1899_v15 = vld [vmem:[#allocation8 + $0xc8] ss:$16 sps:$4 sm:$0xff]   ;;  %v1904_v16 = vld [vmem:[#allocation8 + $0xe4] ss:$16 sps:$4 sm:$0xff]  }
  0xf9   :  { %983 = vmatprep.subr.bf16.mxu0 %v1826_v17  ;;  %1024 = vmatprep.subr.bf16.mxu1 %v1829_v18  ;;  %v1907_v17 = vld [vmem:[#allocation8 + $0xec] ss:$16 sps:$4 sm:$0xff]   ;;  %v1902_v18 = vld [vmem:[#allocation8 + $0xe0] ss:$16 sps:$4 sm:$0xff]  }
  0xfc   :  { %984 = vmatpush1.bf16.msra.mxu0 %v1824_v19  ;;  %1025 = vmatpush1.bf16.msra.mxu1 %v1827_v20  ;;  %v1905_v19 = vld [vmem:[#allocation8 + $0xe8] ss:$16 sps:$4 sm:$0xff]   ;;  %v2348_v20 = vshrl.u32 %v139_v5, 7 }
  0xfd   :  { %985 = vmatprep.subr.bf16.mxu0 %v1832_v21  ;;  %1026 = vmatprep.subr.bf16.mxu1 %v1835_v22  ;;  %v703_v22 = vld [vmem:[%s2432_s5] sm:$0xf] }
  0xfe   :  { %v707_v21 = vsub.s32 0, %v2348_v20 }
 0x100   :  { %986 = vmatpush1.bf16.msra.mxu0 %v1830_v23  ;;  %1027 = vmatpush1.bf16.msra.mxu1 %v1833_v24  ;;  %v711_v23 = vsub.s32 1, %v2348_v20  ;;  %v708_v24 = vrot.slane %v703_v22, %v707_v21 }
 0x101   :  { %987 = vmatprep.subr.bf16.mxu0 %v1838_v25  ;;  %1028 = vmatprep.subr.bf16.mxu1 %v1841_v27 }
 0x102   :  { %v712_v27 = vrot.slane %v703_v22, %v711_v23 }
 0x104   :  { %988 = vmatpush1.bf16.msra.mxu0 %v1836_v26  ;;  %1029 = vmatpush1.bf16.msra.mxu1 %v1839_v28 }
 0x105   :  { %989 = vmatprep.subr.bf16.mxu0 %v1844_v29  ;;  %1030 = vmatprep.subr.bf16.mxu1 %v1847_v31 }
 0x108   :  { %990 = vmatpush1.bf16.msra.mxu0 %v1842_v30  ;;  %1031 = vmatpush1.bf16.msra.mxu1 %v1845_v32 }
 0x109   :  { %991 = vmatprep.subr.bf16.mxu0 %v1850_v33  ;;  %1032 = vmatprep.subr.bf16.mxu1 %v1853_v35  ;;  %v719_v33 = vsub.s32 3, %v2348_v20 }
 0x10c   :  { %992 = vmatpush1.bf16.msra.mxu0 %v1848_v34  ;;  %1033 = vmatpush1.bf16.msra.mxu1 %v1851_v36 }
 0x10d   :  { %993 = vmatprep.subr.bf16.mxu0 %v1856_v37  ;;  %1034 = vmatprep.subr.bf16.mxu1 %v1859_v39 }
 0x110   :  { %994 = vmatpush1.bf16.msra.mxu0 %v1854_v38  ;;  %1035 = vmatpush1.bf16.msra.mxu1 %v1857_v40 }
 0x111   :  { %1221 = vmatprep.subr.bf16.mxu0 %v1862_v43  ;;  %1262 = vmatprep.subr.bf16.mxu1 %v1865_v44  ;;  %v715_v43 = vsub.s32 2, %v2348_v20 }
 0x113   :  { %1012 = vmatmul.mubr.bf16.vlgmr.msra.gmra.mrb[8].mxu0 %v786_v42  ;;  %1053 = vmatmul.mubr.bf16.vlgmr.msra.gmra.mrb[8].mxu1 %v786_v42  ;;  %v720_v42 = vrot.slane %v703_v22, %v719_v33 }
 0x114   :  { %1253 = vmatprep.mubr.bf16.mxu0 %v2170_v0  ;;  %1222 = vmatpush1.bf16.msra.mxu0 %v1860_v45  ;;  %v716_v45 = vrot.slane %v703_v22, %v715_v43 }
 0x115   :  { %1263 = vmatpush1.bf16.msra.mxu1 %v1863_v46  ;;  %1294 = vmatprep.mubr.bf16.mxu1 %v2170_v0 }
 0x116   :  { %1223 = vmatprep.subr.bf16.mxu0 %v1868_v47  ;;  %1264 = vmatprep.subr.bf16.mxu1 %v1871_v48 }
 0x118   :  { %1224 = vmatpush1.bf16.msra.mxu0 %v1866_v49 }
 0x119   :  { %1265 = vmatpush1.bf16.msra.mxu1 %v1869_v50  ;;  %1225 = vmatprep.subr.bf16.mxu0 %v1874_v51 }
 0x11a   :  { %1266 = vmatprep.subr.bf16.mxu1 %v1877_v52 }
 0x11c   :  { %1226 = vmatpush1.bf16.msra.mxu0 %v1872_v53 }
 0x11d   :  { %1267 = vmatpush1.bf16.msra.mxu1 %v1875_v54  ;;  %1227 = vmatprep.subr.bf16.mxu0 %v1880_v55  ;;  %v134_v54 = vld [vmem:[%s2429_s2] sm:$0xff] }
 0x11e   :  { %1268 = vmatprep.subr.bf16.mxu1 %v1883_v56 }
 0x120   :  { %1228 = vmatpush1.bf16.msra.mxu0 %v1878_v57 }
 0x121   :  { %1269 = vmatpush1.bf16.msra.mxu1 %v1881_v58  ;;  %1229 = vmatprep.subr.bf16.mxu0 %v1886_v63 }
 0x122   :  { %1270 = vmatprep.subr.bf16.mxu1 %v1889_v1 }
 0x124   :  { %1230 = vmatpush1.bf16.msra.mxu0 %v1884_v4 }
 0x125   :  { %1271 = vmatpush1.bf16.msra.mxu1 %v1887_v6  ;;  %1231 = vmatprep.subr.bf16.mxu0 %v1892_v8 }
 0x126   :  { %1272 = vmatprep.subr.bf16.mxu1 %v1895_v10  ;;  %v1908_v10 = vld [vmem:[#allocation11] sm:$0xff]  }
 0x128   :  { %1232 = vmatpush1.bf16.msra.mxu0 %v1890_v9 }
 0x129   :  { %1273 = vmatpush1.bf16.msra.mxu1 %v1893_v11  ;;  %1233 = vmatprep.subr.bf16.mxu0 %v1898_v12  ;;  %v2172_v11 = vmov 0.0   ;;  %v1909_v12 = vld [vmem:[#allocation11 + $0x8] sm:$0xff]  }
 0x12a   :  { %1274 = vmatprep.subr.bf16.mxu1 %v1901_v13  ;;  %v1910_v13 = vld [vmem:[#allocation11 + $0x10] sm:$0xff]  }
 0x12c   :  { %1234 = vmatpush1.bf16.msra.mxu0 %v1896_v14  ;;  %v1911_v14 = vld [vmem:[#allocation11 + $0x18] sm:$0xff]  }
 0x12d   :  { %1275 = vmatpush1.bf16.msra.mxu1 %v1899_v15  ;;  %1235 = vmatprep.subr.bf16.mxu0 %v1904_v16  ;;  %v1912_v15 = vld [vmem:[#allocation11 + $0x20] sm:$0xff]   ;;  %v1913_v16 = vld [vmem:[#allocation11 + $0x28] sm:$0xff]  }
 0x12e   :  { %1276 = vmatprep.subr.bf16.mxu1 %v1907_v17  ;;  %v1914_v17 = vld [vmem:[#allocation11 + $0x30] sm:$0xff]  }
 0x130   :  { %1236 = vmatpush1.bf16.msra.mxu0 %v1902_v18  ;;  %v1915_v18 = vld [vmem:[#allocation11 + $0x38] sm:$0xff]  }
 0x131   :  { %1277 = vmatpush1.bf16.msra.mxu1 %v1905_v19  ;;  %1676 = vmatprep.subr.bf16.mxu0 %v2172_v11  ;;  %v1303_v19 = vld [vmem:[%s2435_s8] sm:$0xf] }
 0x132   :  { %v1308_v22 = vrot.slane %v1303_v19, %v707_v21  ;;  %v1320_v21 = vrot.slane %v1303_v19, %v719_v33  ;;  %v135_v33 = vld [vmem:[%s2429_s2 + $0x8] sm:$0xff] }
 0x165   :  { %v413_v59 = vpop.f32.mrb[0].mxu0  ;;  %v454_v60 = vpop.f32.mrb[0].mxu1 }
 0x166   :  { %v415_v0 = vpop.f32.mrb[1].mxu0  ;;  %v456_v62 = vpop.f32.mrb[1].mxu1 }
 0x167   :  { %v417_v61 = vpop.f32.mrb[2].mxu0  ;;  %v458_v3 = vpop.f32.mrb[2].mxu1 }
 0x168   :  { %v418_v2 = vpop.f32.mrb[3].mxu0  ;;  %v459_v7 = vpop.f32.mrb[3].mxu1 }
 0x1c6   :  { %v655_v25 = vpop.f32.mrb[4].mxu0  ;;  %v696_v26 = vpop.f32.mrb[4].mxu1 }
 0x1c7   :  { %v656_v28 = vadd.f32 %v655_v25, %v413_v59  ;;  %v697_v29 = vadd.f32 %v696_v26, %v454_v60  ;;  %v657_v5 = vpop.f32.mrb[5].mxu0  ;;  %v698_v30 = vpop.f32.mrb[5].mxu1  ;;  %v1312_v26 = vrot.slane %v1303_v19, %v711_v23 }
 0x1c8   :  { %v658_v31 = vadd.f32 %v657_v5, %v415_v0  ;;  %v699_v32 = vadd.f32 %v698_v30, %v456_v62  ;;  %v659_v34 = vpop.f32.mrb[6].mxu0  ;;  %v700_v35 = vpop.f32.mrb[6].mxu1 }
 0x1c9   :  { %v725_v36 = vadd.f32 %v708_v24, %v656_v28  ;;  %v660_v37 = vpop.f32.mrb[7].mxu0  ;;  %v701_v38 = vpop.f32.mrb[7].mxu1  ;;  %v727_v47 = vadd.f32 %v716_v45, %v697_v29 }
 0x1ca   :  { %v726_v39 = vadd.f32 %v712_v27, %v658_v31  ;;  %v728_v44 = vadd.f32 %v720_v42, %v699_v32 }
 0x1cb   :  { %v1588_v40 = vmul.f32 -1.442695, %v725_v36 }
 0x1cc   :  { %v1589_v41 = vmul.f32 -1.442695, %v726_v39  ;;  %v1590_v46 = vmul.f32 -1.442695, %v728_v44 }
 0x1cd   :  { %1916 = vpow2.f32 %v1588_v40 }
 0x1ce   :  { %1918 = vpow2.f32 %v1589_v41  ;;  %v1316_v41 = vrot.slane %v1303_v19, %v715_v43 }
 0x1cf   :  { %1920 = vpow2.f32 %v1590_v46 }
 0x1d0   :  { %1922 = vtanh.f32 %v727_v47 }
 0x1d7   :  { %v1917_v48 = vpop.eup %1916 }
 0x1d8   :  { %v1919_v49 = vpop.eup %1918  ;;  %v732_v50 = vadd.f32 1.0, %v1917_v48 }
 0x1d9   :  { %v738_v51 = vadd.f32 1.0, %v1919_v49  ;;  %v1921_v52 = vpop.eup %1920 }
 0x1da   :  { %1924 = vrcp.f32 %v732_v50  ;;  %v1923_v53 = vpop.eup %1922  ;;  %v745_v58 = vadd.f32 1.0, %v1921_v52 }
 0x1db   :  { %1926 = vrcp.f32 %v738_v51 }
 0x1dc   :  { %1928 = vrcp.f32 %v745_v58 }
 0x1e4   :  { %v1925_v55 = vpop.eup %1924 }
 0x1e5   :  { %v1927_v56 = vpop.eup %1926  ;;  %v749_v57 = vmul.f32 %v1925_v55, %v1923_v53 }
 0x1e6   :  { %v748_v59 = vmul.f32 %v1927_v56, %v134_v54  ;;  %v1929_v60 = vpop.eup %1928  ;;  %v1013_v1 = vpop.f32.mrb[8].mxu0 }
 0x1e7   :  { %v1015_v2 = vpop.f32.mrb[9].mxu0  ;;  %v1054_v6 = vpop.f32.mrb[8].mxu1 }
 0x1e8   :  { %v750_v0 = vadd.f32 %v749_v57, %v748_v59  ;;  %v1017_v3 = vpop.f32.mrb[10].mxu0  ;;  %v1056_v7 = vpop.f32.mrb[9].mxu1 }
 0x1e9   :  { %v1018_v4 = vpop.f32.mrb[11].mxu0  ;;  %v1058_v8 = vpop.f32.mrb[10].mxu1 }
 0x1ea   :  { %1468 = vst [vmem:[#allocation16] sm:$0xff] %v750_v0  ;;  %1930 = vtanh.f32 %v750_v0  ;;  %v1059_v9 = vpop.f32.mrb[11].mxu1 }
 0x1f4   :  { %v1931_v61 = vpop.eup %1930 }
 0x1f5   :  { %v752_v62 = vmul.f32 %v1931_v61, %v1929_v60 }
 0x1f7   :  { %v753_v63 = vpack.c.bf16 %v752_v62, %v752_v62  ;;  %1466 = vst [vmem:[#allocation14] sm:$0xff] %v752_v62 }
 0x1f9   :  { %1254 = vmatmul.mubr.bf16.vlgmr.msra.gmra.mrb[12].mxu0 %v753_v63  ;;  %1295 = vmatmul.mubr.bf16.vlgmr.msra.gmra.mrb[12].mxu1 %v753_v63 }
 0x1fa   :  { %1677 = vmatpush3.bf16.msra.mxu0 %v1908_v10  ;;  %1692 = vmatprep.mubr.msk.bf16.mxu0 %vm2173_vm2, %v2172_v11 }
 0x1fb   :  { %1678 = vmatprep.subr.bf16.mxu0 %v2172_v11 }
 0x1fe   :  { %1679 = vmatpush3.bf16.msra.mxu0 %v1909_v12 }
 0x1ff   :  { %1680 = vmatprep.subr.bf16.mxu0 %v2172_v11 }
 0x202   :  { %1681 = vmatpush3.bf16.msra.mxu0 %v1910_v13 }
 0x203   :  { %1682 = vmatprep.subr.bf16.mxu0 %v2172_v11 }
 0x206   :  { %1683 = vmatpush3.bf16.msra.mxu0 %v1911_v14 }
 0x207   :  { %1684 = vmatprep.subr.bf16.mxu0 %v2172_v11 }
 0x20a   :  { %1685 = vmatpush3.bf16.msra.mxu0 %v1912_v15 }
 0x20b   :  { %1686 = vmatprep.subr.bf16.mxu0 %v2172_v11 }
 0x20e   :  { %1687 = vmatpush3.bf16.msra.mxu0 %v1913_v16 }
 0x20f   :  { %1688 = vmatprep.subr.bf16.mxu0 %v2172_v11 }
 0x212   :  { %1689 = vmatpush3.bf16.msra.mxu0 %v1914_v17 }
 0x213   :  { %1690 = vmatprep.subr.bf16.mxu0 %v2172_v11 }
 0x216   :  { %1691 = vmatpush3.bf16.msra.mxu0 %v1915_v18 }
 0x2cc   :  { %v1255_v24 = vpop.f32.mrb[12].mxu0  ;;  %v1296_v25 = vpop.f32.mrb[12].mxu1 }
 0x2cd   :  { %v1256_v27 = vadd.f32 %v1255_v24, %v1013_v1  ;;  %v1297_v28 = vadd.f32 %v1296_v25, %v1054_v6  ;;  %v1257_v29 = vpop.f32.mrb[13].mxu0  ;;  %v1298_v5 = vpop.f32.mrb[13].mxu1 }
 0x2ce   :  { %v1258_v30 = vadd.f32 %v1257_v29, %v1015_v2  ;;  %v1299_v31 = vadd.f32 %v1298_v5, %v1056_v7  ;;  %v1259_v32 = vpop.f32.mrb[14].mxu0  ;;  %v1300_v34 = vpop.f32.mrb[14].mxu1 }
 0x2cf   :  { %v1325_v35 = vadd.f32 %v1308_v22, %v1256_v27  ;;  %v1260_v36 = vpop.f32.mrb[15].mxu0  ;;  %v1301_v37 = vpop.f32.mrb[15].mxu1  ;;  %v1327_v44 = vadd.f32 %v1316_v41, %v1297_v28 }
 0x2d0   :  { %v1326_v38 = vadd.f32 %v1312_v26, %v1258_v30  ;;  %v1328_v23 = vadd.f32 %v1320_v21, %v1299_v31 }
 0x2d1   :  { %v1655_v39 = vmul.f32 -1.442695, %v1325_v35 }
 0x2d2   :  { %v1656_v40 = vmul.f32 -1.442695, %v1326_v38  ;;  %v1657_v42 = vmul.f32 -1.442695, %v1328_v23 }
 0x2d3   :  { %1932 = vpow2.f32 %v1655_v39 }
 0x2d4   :  { %1934 = vpow2.f32 %v1656_v40 }
 0x2d5   :  { %1936 = vpow2.f32 %v1657_v42 }
 0x2d6   :  { %1938 = vtanh.f32 %v1327_v44 }
 0x2dd   :  { %v1933_v45 = vpop.eup %1932 }
 0x2de   :  { %v1935_v46 = vpop.eup %1934  ;;  %v1332_v47 = vadd.f32 1.0, %v1933_v45 }
 0x2df   :  { %v1338_v48 = vadd.f32 1.0, %v1935_v46  ;;  %v1937_v49 = vpop.eup %1936 }
 0x2e0   :  { %1940 = vrcp.f32 %v1332_v47  ;;  %v1939_v50 = vpop.eup %1938  ;;  %v1345_v43 = vadd.f32 1.0, %v1937_v49 }
 0x2e1   :  { %1942 = vrcp.f32 %v1338_v48 }
 0x2e2   :  { %1944 = vrcp.f32 %v1345_v43 }
 0x2ea   :  { %v1941_v51 = vpop.eup %1940 }
 0x2eb   :  { %v1943_v52 = vpop.eup %1942  ;;  %v1349_v20 = vmul.f32 %v1941_v51, %v1939_v50 }
 0x2ec   :  { %v1348_v53 = vmul.f32 %v1943_v52, %v135_v33  ;;  %v1945_v55 = vpop.eup %1944 }
 0x2ee   :  { %v1350_v54 = vadd.f32 %v1349_v20, %v1348_v53 }
 0x2f0   :  { %1469 = vst [vmem:[#allocation16 + $0x8] sm:$0xff] %v1350_v54  ;;  %1946 = vtanh.f32 %v1350_v54 }
 0x2fa   :  { %v1947_v56 = vpop.eup %1946 }
 0x2fb   :  { %v1352_v57 = vmul.f32 %v1947_v56, %v1945_v55 }
 0x2fd   :  { %v1353_v58 = vpack.c.bf16 %v1352_v57, %v1352_v57  ;;  %1467 = vst [vmem:[#allocation14 + $0x8] sm:$0xff] %v1352_v57 }
 0x2ff   :  { %1693 = vmatmul.mubr.bf16.vlgmr.msra.gmra.mrb[16].mxu0 %v1353_v58 }
 0x300   :  { %2091 = shalt.err (!%p2088_p10)
}
 0x301   :  { %s2092_s25 = scalar_lea.hbm %s2439_s12, 256 }
 0x302   :  { %p2093_p11 = scmp.ne.s32.totalorder %s2439_s12, %s2092_s25  ;;  %p2096_p12 = scmp.lt.u32.totalorder %s2092_s25, %s2439_s12 }
 0x304   :  { %p2098_p13 = pnand %p2096_p12, %p2093_p11 }
 0x306   :  { %2101 = shalt.err (!%p2098_p13)
}
 0x307   :  { %1491 = dma.vmem_to_hbm [thread:$0]  %s1486_s28, 256, %s2439_s12, [#allocation15], %s2163_s6, %s2163_s6, %s2164_s23  }
 0x308   :  { %s2175_s18 = smov [#allocation16]  }
 0x309   :  { %s1497_s19 = sshll.u32 %s2175_s18, 4  ;;  %s1498_s19 = int_to_ptr.vmem [resolvable:$true] %s1497_s19 }
 0x30a   :  { %s2102_s17 = scalar_lea.vmem %s1498_s19, 256  ;;  %p2107_p1 = scmp.lt.s32.totalorder %s1498_s19, %s1498_s19 }
 0x30b   :  { %p2103_p0 = scmp.ne.s32.totalorder %s1498_s19, %s2102_s17  ;;  %p2108_p2 = scmp.lt.s32.totalorder %s2102_s17, %s2102_s17 }
 0x30d   :  { %p2109_p3 = por %p2108_p2, %p2107_p1 }
 0x30f   :  { %p2110_p4 = pnand %p2109_p3, %p2103_p0 }
 0x311   :  { %2113 = shalt.err (!%p2110_p4)
}
 0x312   :  { %s2114_s0 = scalar_lea.hbm %s2440_s13, 256 }
 0x313   :  { %p2115_p5 = scmp.ne.s32.totalorder %s2440_s13, %s2114_s0  ;;  %p2118_p6 = scmp.lt.u32.totalorder %s2114_s0, %s2440_s13 }
 0x315   :  { %p2120_p7 = pnand %p2118_p6, %p2115_p5 }
 0x317   :  { %2123 = shalt.err (!%p2120_p7)
}
 0x318   :  { %1503 = dma.vmem_to_hbm [thread:$0]  %s1498_s19, 256, %s2440_s13, [#allocation15], %s2163_s6, %s2163_s6, %s2164_s23  }
 0x319   :  { %v1658_v59 = vld [vmem:[%s2437_s10] ss:$0 sm:$0xff]  ;;  %s2176_s27 = smov [#allocation13]  }
 0x31a   :  { %s1476_s28 = sshll.u32 %s2176_s27, 4  ;;  %s1477_s28 = int_to_ptr.vmem [resolvable:$true] %s1476_s28 }
 0x31b   :  { %s2124_s29 = scalar_lea.vmem %s1477_s28, 128  ;;  %p2129_p9 = scmp.lt.s32.totalorder %s1477_s28, %s1477_s28 }
 0x31c   :  { %p2125_p8 = scmp.ne.s32.totalorder %s1477_s28, %s2124_s29  ;;  %p2130_p10 = scmp.lt.s32.totalorder %s2124_s29, %s2124_s29 }
 0x31e   :  { %p2131_p11 = por %p2130_p10, %p2129_p9 }
 0x320   :  { %p2132_p12 = pnand %p2131_p11, %p2125_p8 }
 0x3d2   :  { %v1459_v0 = vpop.f32.mrb[16].mxu0 }
 0x3d3   :  { %v1460_v60 = vadd.f32 %v1658_v59, %v1459_v0  ;;  %v1694_v61 = vpop.f32.mrb[17].mxu0 }
 0x3d4   :  { %v1462_v62 = vpop.f32.mrb[18].mxu0 }
 0x3d5   :  { %1465 = vst [vmem:[#allocation13] sm:$0xff] %v1460_v60  ;;  %v1695_v63 = vpop.f32.mrb[19].mxu0 }
 0x3d6   :  { %2135 = shalt.err (!%p2132_p12)
}
 0x3d7   :  { %s2136_s10 = scalar_lea.hbm %s2438_s11, 128 }
 0x3d8   :  { %p2137_p13 = scmp.ne.s32.totalorder %s2438_s11, %s2136_s10  ;;  %p2140_p0 = scmp.lt.u32.totalorder %s2136_s10, %s2438_s11 }
 0x3da   :  { %p2142_p1 = pnand %p2140_p0, %p2137_p13 }
 0x3dc   :  { %2145 = shalt.err (!%p2142_p1)
}
 0x3dd   :  { %1479 = dma.vmem_to_hbm [thread:$0]  %s1477_s28, 128, %s2438_s11, [#allocation4]  }
 0x3de   :  { %2154 = dma.done.wait [#allocation4], 128  }
 0x3df   :  { %2155 = vsyncadd [#allocation4], 4294967168 }
 0x3e0   :  { %2156 = dma.done.wait [#allocation15], 512  }
 0x3e1   :  { %2157 = vsyncadd [#allocation15], 4294966784 }
 0x3e2   :  { %1513 = vsyncpa [#allocation3], 1 }
 0x3e3   :  { %1514 = vsyncpa [#allocation6], 1 }
 0x3e4   :  { %1515 = vsyncpa [#allocation9], 1 }
 0x3e5   :  { %1516 = vsyncpa [#allocation12], 1 }
 0x3e6   :  { %1517 = vsyncpa [#allocation4], 1 }
 0x3e7   :  { %1518 = vsyncpa [#allocation15], 1 }

</bundles_post_ra>
